<compile_context>
chip_gen: v6e
topology: v6e:2x2x1
jax: 0.10.0
libtpu: 0.0.40
codegen_flags: <defaults>
</compile_context>

<pallas_src>
import functools

import jax
import jax.numpy as jnp
from jax.experimental import pallas as pl
from jax.experimental.pallas import tpu as pltpu

N_EMBD = 384
DROPOUT_P = 0.2


def _ffw_kernel(x_ref, w1_ref, b1_ref, w2_ref, b2_ref, *rest,
                dropout_p, training):
    """One (tm, C) row tile of  Dropout(Linear2(ReLU(Linear1(x))))."""
    use_dropout = training and dropout_p > 0.0
    if use_dropout:
        u_ref, o_ref = rest
    else:
        (o_ref,) = rest

    # Linear1: bf16 x bf16 on the MXU, f32 accumulation; bias + ReLU in f32.
    h = jnp.dot(x_ref[...], w1_ref[...], preferred_element_type=jnp.float32)
    h = jnp.maximum(h + b1_ref[...], 0.0)

    # Linear2: cast the activation back to bf16 for the MXU, accumulate f32.
    y = jnp.dot(h.astype(jnp.bfloat16), w2_ref[...],
                preferred_element_type=jnp.float32)
    y = y + b2_ref[...]

    if use_dropout:
        # Inverted dropout: keep with prob (1-p), scale kept values by 1/(1-p).
        # Single VPU compare + select per element.
        keep = u_ref[...] >= jnp.float32(dropout_p)
        y = jnp.where(keep, y * jnp.float32(1.0 / (1.0 - dropout_p)), 0.0)

    o_ref[...] = y.astype(o_ref.dtype)


def _resident_spec(block_shape):
    """Spec for operands whose block never changes across the grid (weights).

    Single-buffer them to save VMEM; fall back to a plain BlockSpec if this
    Pallas version does not expose `pipeline_mode`.
    """
    index_map = lambda i: (0,) * len(block_shape)
    try:
        return pl.BlockSpec(block_shape, index_map,
                            pipeline_mode=pl.Buffered(buffer_count=1))
    except TypeError:
        return pl.BlockSpec(block_shape, index_map)


def feed_forward(x, w1, b1, w2, b2, *, key=None, training=True,
                 dropout_p=DROPOUT_P, tm=256):
    """x: (B, T, C) float32 -> (B, T, C) float32.

    Weights are stored (in_features, out_features) so the kernel computes
    x @ W + b (transpose of PyTorch's (out, in) storage).
    """
    B, T, C = x.shape
    Cin, H = w1.shape
    assert Cin == C and w2.shape == (H, C) and b1.shape == (H,) and b2.shape == (C,)
    assert C % 128 == 0 and H % 128 == 0, "lane dims must be multiples of 128"

    M = B * T
    out_dtype = x.dtype

    # --- row-tile selection -------------------------------------------------
    # Large tiles keep the MXU occupied; keep >=2 grid steps so the 'parallel'
    # axis can shard across the two TensorCores of a v7x megacore.
    tm = max(8, min(int(tm), M))
    if M >= 16:
        tm = min(tm, max(8, (M // 2) // 8 * 8))
    tm = max(8, (tm // 8) * 8)
    n_tiles = pl.cdiv(M, tm)
    M_pad = n_tiles * tm

    # --- operand preparation --------------------------------------------
    x2d = x.reshape(M, C)
    if M_pad != M:
        x2d = jnp.pad(x2d, ((0, M_pad - M), (0, 0)))
    x2d = x2d.astype(jnp.bfloat16)            # MXU-native, half the DMA bytes
    w1_b = w1.astype(jnp.bfloat16)
    w2_b = w2.astype(jnp.bfloat16)
    b1_2d = b1.reshape(1, H).astype(jnp.float32)
    b2_2d = b2.reshape(1, C).astype(jnp.float32)

    use_dropout = training and dropout_p > 0.0
    inputs = [x2d, w1_b, b1_2d, w2_b, b2_2d]
    in_specs = [
        pl.BlockSpec((tm, C), lambda i: (i, 0)),   # x row tile
        _resident_spec((C, H)),                    # W1 (resident)
        _resident_spec((1, H)),                    # b1
        _resident_spec((H, C)),                    # W2 (resident)
        _resident_spec((1, C)),                    # b2
    ]
    if use_dropout:
        if key is None:
            key = jax.random.PRNGKey(0)
        u = jax.random.uniform(key, (M_pad, C), jnp.float32)
        inputs.append(u)
        in_specs.append(pl.BlockSpec((tm, C), lambda i: (i, 0)))

    kernel = functools.partial(_ffw_kernel, dropout_p=float(dropout_p),
                               training=bool(training))

    bytes_accessed = (x2d.size * 2 + w1_b.size * 2 + w2_b.size * 2
                      + b1_2d.size * 4 + b2_2d.size * 4 + M_pad * C * 4
                      + (M_pad * C * 4 if use_dropout else 0))
    cost = pl.CostEstimate(flops=4 * M_pad * C * H, transcendentals=0,
                           bytes_accessed=bytes_accessed)

    out2d = pl.pallas_call(
        kernel,
        out_shape=jax.ShapeDtypeStruct((M_pad, C), out_dtype),
        grid=(n_tiles,),
        in_specs=in_specs,
        out_specs=pl.BlockSpec((tm, C), lambda i: (i, 0)),  # lane-dense (C=384)
        compiler_params=pltpu.CompilerParams(
            dimension_semantics=("parallel",),
            vmem_limit_bytes=32 * 1024 * 1024,
        ),
        cost_estimate=cost,
    )(*inputs)

    if M_pad != M:
        out2d = out2d[:M]
    return out2d.reshape(B, T, C)


def init_params(key, n_embd=N_EMBD):
    """Deterministic init matching nn.Linear's U(-1/sqrt(fan_in), 1/sqrt(fan_in))."""
    h = 4 * n_embd
    k1, k2, k3, k4 = jax.random.split(key, 4)
    bound1 = 1.0 / jnp.sqrt(n_embd)
    bound2 = 1.0 / jnp.sqrt(h)
    w1 = jax.random.uniform(k1, (n_embd, h), jnp.float32, -bound1, bound1)
    b1 = jax.random.uniform(k2, (h,), jnp.float32, -bound1, bound1)
    w2 = jax.random.uniform(k3, (h, n_embd), jnp.float32, -bound2, bound2)
    b2 = jax.random.uniform(k4, (n_embd,), jnp.float32, -bound2, bound2)
    return w1, b1, w2, b2


if __name__ == "__main__":
    key = jax.random.PRNGKey(0)
    kp, kx, kd = jax.random.split(key, 3)

    B, T, C = 2, 8, N_EMBD
    w1, b1, w2, b2 = init_params(kp, C)
    x = jax.random.normal(kx, (B, T, C), jnp.float32)

    # Eval mode (dropout = identity): check against a pure-JAX f32 reference.
    y_eval = feed_forward(x, w1, b1, w2, b2, training=False)
    jax.block_until_ready(y_eval)
    ref = jnp.maximum(x.reshape(-1, C) @ w1 + b1, 0.0) @ w2 + b2
    ref = ref.reshape(B, T, C)
    assert y_eval.shape == (B, T, C)
    # bf16 matmul inputs with f32 accumulation -> loose tolerance vs f32 ref.
    assert jnp.allclose(y_eval, ref, rtol=5e-2, atol=5e-2), "mismatch vs reference"

    # Training mode (dropout active, deterministic JAX key).
    # TODO(synk): dropout mask comes from JAX's RNG, not PyTorch's RNG stream.
    y_train = feed_forward(x, w1, b1, w2, b2, key=kd, training=True)
    jax.block_until_ready(y_train)
    assert y_train.shape == (B, T, C)

    print("KERNEL_OK")
</pallas_src>

<mosaic_0001>
module attributes {stable_mosaic.version = 11 : i64} {
  func.func @_ffw_kernel(%arg0: i32, %arg1: memref<8x384xbf16, #tpu.memory_space<vmem>>, %arg2: memref<384x1536xbf16, #tpu.memory_space<vmem>>, %arg3: memref<1x1536xf32, #tpu.memory_space<vmem>>, %arg4: memref<1536x384xbf16, #tpu.memory_space<vmem>>, %arg5: memref<1x384xf32, #tpu.memory_space<vmem>>, %arg6: memref<8x384xf32, #tpu.memory_space<vmem>>) attributes {dimension_semantics = [#tpu.dimension_semantics<parallel>], iteration_bounds = array<i64: 2>, scalar_prefetch = 0 : i64, scratch_operands = 0 : i64, tpu.core_type = #tpu.core_type<tc>, window_params = [{transform_indices = @transform_0, window_bounds = array<i64: 8, 384>}, {pipeline_mode = #tpu.pipeline_mode<synchronous>, transform_indices = @transform_1, window_bounds = array<i64: 384, 1536>}, {pipeline_mode = #tpu.pipeline_mode<synchronous>, transform_indices = @transform_2, window_bounds = array<i64: 1, 1536>}, {pipeline_mode = #tpu.pipeline_mode<synchronous>, transform_indices = @transform_3, window_bounds = array<i64: 1536, 384>}, {pipeline_mode = #tpu.pipeline_mode<synchronous>, transform_indices = @transform_4, window_bounds = array<i64: 1, 384>}, {transform_indices = @transform_5, window_bounds = array<i64: 8, 384>}]} {
    %c0 = arith.constant 0 : index
    %c0_0 = arith.constant 0 : index
    %0 = vector.load %arg1[%c0, %c0_0] : memref<8x384xbf16, #tpu.memory_space<vmem>>, vector<8x384xbf16>
    %c0_1 = arith.constant 0 : index
    %c0_2 = arith.constant 0 : index
    %1 = vector.load %arg2[%c0_1, %c0_2] : memref<384x1536xbf16, #tpu.memory_space<vmem>>, vector<384x1536xbf16>
    %cst = arith.constant dense<0.000000e+00> : vector<8x1536xf32>
    %2 = tpu.matmul %0, %1, %cst {dimension_numbers = #tpu.dot_dimension_numbers<[1], [0], [0], [1], [0, 0, 1, 1], [], []>} : vector<8x384xbf16>, vector<384x1536xbf16>, vector<8x1536xf32> -> vector<8x1536xf32>
    %c0_3 = arith.constant 0 : index
    %c0_4 = arith.constant 0 : index
    %3 = vector.load %arg3[%c0_3, %c0_4] : memref<1x1536xf32, #tpu.memory_space<vmem>>, vector<1x1536xf32>
    %4 = vector.broadcast %3 : vector<1x1536xf32> to vector<8x1536xf32>
    %5 = arith.addf %2, %4 : vector<8x1536xf32>
    %cst_5 = arith.constant 0.000000e+00 : f32
    %6 = vector.broadcast %cst_5 : f32 to vector<8x1536xf32>
    %7 = arith.maximumf %5, %6 : vector<8x1536xf32>
    %8 = arith.truncf %7 : vector<8x1536xf32> to vector<8x1536xbf16>
    %c0_6 = arith.constant 0 : index
    %c0_7 = arith.constant 0 : index
    %9 = vector.load %arg4[%c0_6, %c0_7] : memref<1536x384xbf16, #tpu.memory_space<vmem>>, vector<1536x384xbf16>
    %cst_8 = arith.constant dense<0.000000e+00> : vector<8x384xf32>
    %10 = tpu.matmul %8, %9, %cst_8 {dimension_numbers = #tpu.dot_dimension_numbers<[1], [0], [0], [1], [0, 0, 1, 1], [], []>} : vector<8x1536xbf16>, vector<1536x384xbf16>, vector<8x384xf32> -> vector<8x384xf32>
    %c0_9 = arith.constant 0 : index
    %c0_10 = arith.constant 0 : index
    %11 = vector.load %arg5[%c0_9, %c0_10] : memref<1x384xf32, #tpu.memory_space<vmem>>, vector<1x384xf32>
    %12 = vector.broadcast %11 : vector<1x384xf32> to vector<8x384xf32>
    %13 = arith.addf %10, %12 : vector<8x384xf32>
    %c0_11 = arith.constant 0 : index
    %c0_12 = arith.constant 0 : index
    %14 = vector.load %arg6[%c0_11, %c0_12] : memref<8x384xf32, #tpu.memory_space<vmem>>, vector<8x384xf32>
    tpu.vector_store %arg6[%c0_11, %c0_12], %13 {strides = array<i32>} : memref<8x384xf32, #tpu.memory_space<vmem>>, vector<8x384xf32>,
    return
  }
  func.func @transform_0(%arg0: i32) -> (i32, i32) {
    %c0_i32 = arith.constant 0 : i32
    %c0_i32_0 = arith.constant 0 : i32
    return %arg0, %c0_i32 : i32, i32
  }
  func.func @transform_1(%arg0: i32) -> (i32, i32) {
    %c0_i32 = arith.constant 0 : i32
    %c0_i32_0 = arith.constant 0 : i32
    %c0_i32_1 = arith.constant 0 : i32
    return %c0_i32, %c0_i32_0 : i32, i32
  }
  func.func @transform_2(%arg0: i32) -> (i32, i32) {
    %c0_i32 = arith.constant 0 : i32
    %c0_i32_0 = arith.constant 0 : i32
    %c0_i32_1 = arith.constant 0 : i32
    return %c0_i32, %c0_i32_0 : i32, i32
  }
  func.func @transform_3(%arg0: i32) -> (i32, i32) {
    %c0_i32 = arith.constant 0 : i32
    %c0_i32_0 = arith.constant 0 : i32
    %c0_i32_1 = arith.constant 0 : i32
    return %c0_i32, %c0_i32_0 : i32, i32
  }
  func.func @transform_4(%arg0: i32) -> (i32, i32) {
    %c0_i32 = arith.constant 0 : i32
    %c0_i32_0 = arith.constant 0 : i32
    %c0_i32_1 = arith.constant 0 : i32
    return %c0_i32, %c0_i32_0 : i32, i32
  }
  func.func @transform_5(%arg0: i32) -> (i32, i32) {
    %c0_i32 = arith.constant 0 : i32
    %c0_i32_0 = arith.constant 0 : i32
    return %arg0, %c0_i32 : i32, i32
  }
}

</mosaic_0001>

<bundles_post_ra>
// kernel: tpu_custom_call.1
= control target key start
LH: loop header
LB: loop body
LE: loop exit
PB: predicated region body
PF: predicated region fallthrough
CT: control target
= control target key end

     0   :  { %10 = vsyncpa [#allocation3], 0  ;;  %s7435_s0 = inlined_call_operand.hbm [shape: bf16[16,384], index: 0, kind: input, shape index: {}]   ;;  %s7436_s1 = inlined_call_operand.hbm [shape: bf16[384,1536], index: 1, kind: input, shape index: {}]   ;;  %s7437_s2 = inlined_call_operand.hbm [shape: f32[1,1536], index: 2, kind: input, shape index: {}]   ;;  %s7438_s3 = inlined_call_operand.hbm [shape: bf16[1536,384], index: 3, kind: input, shape index: {}]   ;;  %s7439_s4 = inlined_call_operand.hbm [shape: f32[1,384], index: 4, kind: input, shape index: {}]   ;;  %s7440_s5 = inlined_call_operand.hbm [shape: f32[16,384], index: 5, kind: output, shape index: {}]  }
   0x1   :  { %12 = vsyncpa [#allocation3 + $0x1], 0 }
   0x2   :  { %13 = vsyncpa [#allocation6], 0 }
   0x3   :  { %14 = vsyncpa [#allocation9], 0 }
   0x4   :  { %15 = vsyncpa [#allocation4], 0 }
   0x5   :  { %17 = vsyncpa [#allocation4 + $0x1], 0  ;;  %s7058_s18 = smov 0   ;;  %s7060_s19 = smov 0  }
   0x6   :  { %s7062_s20 = smov 0   ;;  %s7064_s21 = smov 0  }
   0x7 LB: > { %s7017_s22 = smov [#allocation5]   ;;  %s7079_s24 = sadd.s32 4294967295, %s7015_s21   ;;  %s7015_s21 = sphi %s7064_s21, %s7463_s21   ;;  %s7011_s20 = sphi %s7062_s20, %s7462_s20   ;;  %s7007_s19 = sphi %s7060_s19, %s7461_s19   ;;  %s7003_s18 = sphi %s7058_s18, %s7460_s18  }
   0x8   : > { %s176_s23 = sshll.u32 %s7017_s22, 4  ;;  %p5167_p0 = scmp.ge.s32.totalorder %s7015_s21, 1  ;;  %s177_s23 = int_to_ptr.vmem [resolvable:$true] %s176_s23 }
   0x9   : > { %p7441_p1 = scmp.eq.s32.totalorder %s7079_s24, 0  ;;  %p164_p2 = scmp.lt.s32.totalorder %s7015_s21, 3 }
   0xa   : > { %s7018_s26 = smov [#allocation8]   ;;  %s7019_s29 = smov [#allocation7]  }
   0xb   : > { %p7084_p3 = pnand %p5167_p0, %p164_p2  ;;  %s200_s27 = sshll.u32 %s7018_s26, 4  ;;  %s7097_s27 = int_to_ptr.vmem [resolvable:$true] %s200_s27 }
   0xc   : > { %s7099_s30 = sshll.u32 %s7019_s29, 4  ;;  %s6822_s6 = scalar_lea.vmem %s177_s23, 36864  ;;  %s191_s30 = int_to_ptr.vmem [resolvable:$true] %s7099_s30 }
   0xd   : > { %s7445_s25 = scalar_select %p7084_p3, 1, 0 }
   0xe   : > { %p5918_p5 = pneg %p7084_p3  ;;  %p6823_p8 = scmp.ne.s32.totalorder %s177_s23, %s6822_s6 }
   0xf   : > { %p6830_p11 = scmp.lt.s32.totalorder %s177_s23, %s177_s23  ;;  %p6831_p12 = scmp.lt.s32.totalorder %s6822_s6, %s6822_s6 }
  0x10   : > { %p7093_p6 = pnand %p5918_p5, %p7441_p1 }
  0x11   : > { %p6832_p13 = por %p6831_p12, %p6830_p11 }
  0x12   : > { %p6813_p7 = pneg %p7093_p6 }
  0x14   : > { %p6825_p9 = pnand %p6823_p8, %p6813_p7 }
  0x16   : > { %p6826_p10 = pneg %p6825_p9 }
  0x18   : > { %p6833_p0 = pnand %p6832_p13, %p6826_p10 }
  0x1a   : > { %6836 = shalt.err (!%p6833_p0)
}
  0x1b   : > { %s7020_s7 = smov 768   ;;  %s7021_s8 = smov 48  }
  0x1c   : > { %5921 = dma.hbm_to_vmem [thread:$0]  (!%p7093_p6), %s7436_s1, 36864, %s177_s23, [#allocation6], %s7020_s7, %s7020_s7, %s7021_s8  }
  0x1d   : > { %s6848_s11 = scalar_lea.vmem %s7097_s27, 36864  ;;  %p6856_p9 = scmp.lt.s32.totalorder %s7097_s27, %s7097_s27 }
  0x1e   : > { %p6849_p2 = scmp.ne.s32.totalorder %s7097_s27, %s6848_s11  ;;  %p6857_p10 = scmp.lt.s32.totalorder %s6848_s11, %s6848_s11 }
  0x20   : > { %p6851_p5 = pnand %p6849_p2, %p6813_p7  ;;  %p6858_p11 = por %p6857_p10, %p6856_p9 }
  0x22   : > { %p6852_p8 = pneg %p6851_p5 }
  0x24   : > { %p6859_p12 = pnand %p6858_p11, %p6852_p8 }
  0x26   : > { %6862 = shalt.err (!%p6859_p12)
}
  0x27   : > { %s7022_s12 = smov 192   ;;  %s7023_s13 = smov 12  }
  0x28   : > { %5927 = dma.hbm_to_vmem [thread:$0]  (!%p7093_p6), %s7438_s3, 36864, %s7097_s27, [#allocation9], %s7022_s12, %s7022_s12, %s7023_s13  }
  0x29   : > { %s6874_s16 = scalar_lea.vmem %s191_s30, 192  ;;  %p6882_p5 = scmp.lt.s32.totalorder %s191_s30, %s191_s30 }
  0x2a   : > { %p6875_p13 = scmp.ne.s32.totalorder %s191_s30, %s6874_s16  ;;  %p6883_p8 = scmp.lt.s32.totalorder %s6874_s16, %s6874_s16 }
  0x2c   : > { %p6877_p0 = pnand %p6875_p13, %p6813_p7  ;;  %p6884_p9 = por %p6883_p8, %p6882_p5 }
  0x2e   : > { %p6878_p2 = pneg %p6877_p0 }
  0x30   : > { %p6885_p10 = pnand %p6884_p9, %p6878_p2 }
  0x32   : > { %6888 = shalt.err (!%p6885_p10)
}
  0x33   : > { %5924 = dma.hbm_to_vmem [thread:$0]  (!%p7093_p6), %s7437_s2, 192, %s191_s30, [#allocation6]  }
  0x34   : > { %s7024_s23 = smov [#allocation10]  }
  0x35   : > { %s214_s26 = sshll.u32 %s7024_s23, 4  ;;  %s215_s26 = int_to_ptr.vmem [resolvable:$true] %s214_s26 }
  0x36   : > { %s6900_s27 = scalar_lea.vmem %s215_s26, 48  ;;  %s6907_s29 = scalar_lea.vmem %s215_s26, 64 }
  0x37   : > { %p6901_p11 = scmp.ne.s32.totalorder %s215_s26, %s6900_s27  ;;  %p6908_p0 = scmp.lt.s32.totalorder %s215_s26, %s215_s26 }
  0x38   : > { %p6909_p2 = scmp.lt.s32.totalorder %s6907_s29, %s6900_s27 }
  0x39   : > { %p6903_p12 = pnand %p6901_p11, %p6813_p7 }
  0x3a   : > { %p6910_p5 = por %p6909_p2, %p6908_p0 }
  0x3b   : > { %p6904_p13 = pneg %p6903_p12 }
  0x3d   : > { %p6911_p8 = pnand %p6910_p5, %p6904_p13 }
  0x3f   : > { %6914 = shalt.err (!%p6911_p8)
}
  0x40   : > { %5930 = dma.hbm_to_vmem [thread:$0]  (!%p7093_p6), %s7439_s4, 48, %s215_s26, [#allocation9]  }
  0x41   : > { %s5166_s30 = sadd.s32 4294967294, %s7015_s21   ;;  %s7143_s28 = sadd.s32 1, %s7015_s21  }
  0x42   : > { %s27_s8 = ssub.s32 %s7015_s21, %s7143_s28  ;;  %s30_s9 = sadd.s32 1, %s7011_s20 }
  0x43   : > { %p28_p7 = scmp.eq.s32.totalorder %s27_s8, 0  ;;  %p37_p9 = scmp.ne.s32.totalorder %s7011_s20, %s7007_s19 }
  0x44   : > { %p38_p10 = scmp.eq.s32.totalorder %s7015_s21, 0  ;;  %p43_p11 = scmp.ne.s32.totalorder %s7007_s19, %s7003_s18 }
  0x45   : > { %s7154_s10 = scalar_select %p28_p7, %s7011_s20, %s30_s9  }
  0x46   : > { %p39_p12 = por %p38_p10, %p37_p9  ;;  %p7158_p13 = por %p7441_p1, %p43_p11 }
  0x47   : > { %p151_p6 = scmp.eq.s32.totalorder %s7079_s24, 1  ;;  %p157_p0 = scmp.eq.s32.totalorder %s5166_s30, 1 }
  0x48   : > { %s7447_s11 = scalar_select %p7158_p13, 1, 0 }
  0x49   : > { %p5943_p2 = scmp.lt.s32.totalorder %s7015_s21, 2  ;;  %s225_s12 = sand.u32 1, %s7011_s20  }
  0x4a   : > { %p7165_p5 = por %p151_p6, %p37_p9  ;;  %p7169_p8 = por %p157_p0, %p43_p11 }
  0x4b   : > { %s5893_s15 = smul.u32 12, %s225_s12  ;;  %p7174_p7 = pnand %p5943_p2, %p39_p12 }
  0x4c   : > { %s7448_s13 = scalar_select %p7165_p5, 1, 0 }
  0x4d   : > { %s7449_s14 = scalar_select %p7169_p8, 1, 0 }
  0x4e   : > { %s5894_s16 = smul.u32 192, %s7015_s21  ;;  %s229_s27 = scalar_lea.vmem [#allocation2], %s5893_s15 }
  0x4f   : > { %s237_s29 = sshll.u32 %s229_s27, 4  ;;  %s226_s6 = scalar_lea.sflag [#allocation3], %s225_s12  ;;  %s238_s29 = int_to_ptr.vmem [resolvable:$true] %s237_s29 }
  0x50   : > { %s7181_s26 = scalar_lea.hbm %s7435_s0, %s5894_s16  ;;  %p6917_p10 = pneg %p7174_p7 }
  0x51   : > { %s6915_s7 = scalar_lea.hbm %s7181_s26, 192  ;;  %s6920_s9 = scalar_lea.hbm %s7435_s0, 384 }
  0x52   : > { %p6916_p9 = scmp.ne.s32.totalorder %s7181_s26, %s6915_s7  ;;  %p6921_p6 = scmp.lt.s32.totalorder %s7181_s26, %s7435_s0 }
  0x53   : > { %p6922_p0 = scmp.lt.s32.totalorder %s6920_s9, %s6915_s7 }
  0x54   : > { %p6918_p11 = pnand %p6917_p10, %p6916_p9 }
  0x55   : > { %p6923_p2 = por %p6922_p0, %p6921_p6 }
  0x56   : > { %p6919_p12 = pneg %p6918_p11 }
  0x58   : > { %p6924_p4 = pnand %p6923_p2, %p6919_p12 }
  0x5a   : > { %6927 = shalt.err (!%p6924_p4)
}
  0x5b   : > { %s6928_s15 = scalar_lea.vmem %s238_s29, 192  ;;  %s7025_s12 = smov [#allocation2]  }
  0x5c   : > { %p6929_p1 = scmp.ne.s32.totalorder %s238_s29, %s6928_s15  ;;  %s6933_s23 = sshll.u32 %s7025_s12, 4  ;;  %s6934_s23 = int_to_ptr.vmem [resolvable:$false] %s6933_s23 }
  0x5d   : > { %s6935_s27 = scalar_lea.vmem %s6934_s23, 384  ;;  %p6936_p9 = scmp.lt.s32.totalorder %s238_s29, %s6934_s23 }
  0x5e   : > { %p6931_p8 = pnand %p6929_p1, %p6917_p10  ;;  %p6937_p11 = scmp.lt.s32.totalorder %s6935_s27, %s6928_s15 }
  0x60   : > { %p6932_p5 = pneg %p6931_p8  ;;  %p6938_p13 = por %p6937_p11, %p6936_p9 }
  0x62   : > { %p6939_p3 = pnand %p6938_p13, %p6932_p5 }
  0x64   : > { %6942 = shalt.err (!%p6939_p3)
}
  0x65   : > { %5934 = dma.hbm_to_vmem [thread:$0]  (!%p7174_p7), %s7181_s26, 192, %s238_s29, %s226_s6  }
  0x66   : > { %p7451_p12 = scmp.ne.s32.totalorder %s7445_s25, 0 }
  0x67   : > { %s7200_s7 = sand.u32 (!%p7451_p12), 1, %s7007_s19   ;;  %p7452_p1 = scmp.ne.s32.totalorder (!%p7451_p12), %s7447_s11, 0 }
  0x68   : > { %246 = sbr.rel (%p7451_p12) target bundleno = 918 (0x396), region = 40  ;;  %s249_s8 = scalar_lea.sflag (!%p7451_p12), [#allocation3], %s7200_s7 }
  0x69   : > { %s5895_s30 = smul.u32 (!%p7451_p12), 12, %s7200_s7 }
  0x6b   : > { %s7204_s9 = scalar_lea.vmem (!%p7451_p12), [#allocation2], %s5895_s30 }
  0x6d   : > { %6986 = dma.done.wait (%p7452_p1), %s249_s8, 192  }
  0x6e   : > { %6988 = vsyncadd (%p7452_p1), %s249_s8, 4294967104  ;;  %p7453_p3 = scmp.eq.s32.totalorder %s7079_s24, 0 }
  0x70   : > { %6990 = dma.done.wait (%p7453_p3), [#allocation6], 37056   ;;  %p7454_p4 = pmov %p7453_p3 }
  0x71   : > { %p7455_p13 = pmov %p7453_p3 }
  0x72   : > { %6992 = vsyncadd (%p7454_p4), [#allocation6], 4294930240 }
  0x73   : > { %6994 = dma.done.wait (%p7455_p13), [#allocation9], 36912   ;;  %p7456_p5 = pmov %p7453_p3 }
  0x74   : > { %v7026_v0 = vmov 0   ;;  %v5990_v1 = vld [vmem:[#allocation5 + $0x2a4] ss:$48 sps:$4 sm:$0xff]   ;;  %v5994_v3 = vld [vmem:[#allocation5 + $0x2a0] ss:$48 sps:$4 sm:$0xff]   ;;  %s5896_s25 = smul.u32 24, %s7200_s7 }
  0x75   : > { %6996 = vsyncadd (%p7456_p5), [#allocation9], 4294930384  ;;  %2174 = vmatprep.mubr.bf16.mxu1 %v7026_v0  ;;  %v5992_v2 = vld [vmem:[#allocation5 + $0x8a4] ss:$48 sps:$4 sm:$0xff]   ;;  %2101 = vmatprep.subr.bf16.mxu0 %v5990_v1  ;;  %v5995_v4 = vld [vmem:[#allocation5 + $0x8a0] ss:$48 sps:$4 sm:$0xff]  }
  0x76   : > { %2142 = vmatprep.subr.bf16.mxu1 %v5992_v2  ;;  %v5996_v5 = vld [vmem:[#allocation5 + $0x244] ss:$48 sps:$4 sm:$0xff]   ;;  %2102 = vmatpush1.bf16.msra.mxu0 %v5994_v3  ;;  %v6000_v7 = vld [vmem:[#allocation5 + $0x240] ss:$48 sps:$4 sm:$0xff]   ;;  %v6043_v34 = vld [vmem:[#allocation5 + $0x2ac] ss:$48 sps:$4 sm:$0xff]  }
  0x77   : > { %2143 = vmatpush1.bf16.msra.mxu1 %v5995_v4  ;;  %v5998_v6 = vld [vmem:[#allocation5 + $0x844] ss:$48 sps:$4 sm:$0xff]   ;;  %2103 = vmatprep.subr.bf16.mxu0 %v5996_v5  ;;  %v6001_v8 = vld [vmem:[#allocation5 + $0x840] ss:$48 sps:$4 sm:$0xff]   ;;  %v6041_v36 = vld [vmem:[#allocation5 + $0x2a8] ss:$48 sps:$4 sm:$0xff]  }
  0x78   : > { %2144 = vmatprep.subr.bf16.mxu1 %v5998_v6  ;;  %v6002_v9 = vld [vmem:[#allocation5 + $0x1e4] ss:$48 sps:$4 sm:$0xff]   ;;  %v6006_v11 = vld [vmem:[#allocation5 + $0x1e0] ss:$48 sps:$4 sm:$0xff]   ;;  %v6049_v39 = vld [vmem:[#allocation5 + $0x24c] ss:$48 sps:$4 sm:$0xff]  }
  0x79   : > { %v6004_v10 = vld [vmem:[#allocation5 + $0x7e4] ss:$48 sps:$4 sm:$0xff]   ;;  %v6007_v12 = vld [vmem:[#allocation5 + $0x7e0] ss:$48 sps:$4 sm:$0xff]   ;;  %v6047_v40 = vld [vmem:[#allocation5 + $0x248] ss:$48 sps:$4 sm:$0xff]  }
  0x7a   : > { %2104 = vmatpush1.bf16.msra.mxu0 %v6000_v7  ;;  %v6008_v13 = vld [vmem:[#allocation5 + $0x184] ss:$48 sps:$4 sm:$0xff]   ;;  %v6012_v15 = vld [vmem:[#allocation5 + $0x180] ss:$48 sps:$4 sm:$0xff]   ;;  %v6055_v43 = vld [vmem:[#allocation5 + $0x1ec] ss:$48 sps:$4 sm:$0xff]  }
  0x7b   : > { %2145 = vmatpush1.bf16.msra.mxu1 %v6001_v8  ;;  %2105 = vmatprep.subr.bf16.mxu0 %v6002_v9  ;;  %v6010_v14 = vld [vmem:[#allocation5 + $0x784] ss:$48 sps:$4 sm:$0xff]   ;;  %v6013_v16 = vld [vmem:[#allocation5 + $0x780] ss:$48 sps:$4 sm:$0xff]   ;;  %v6053_v44 = vld [vmem:[#allocation5 + $0x1e8] ss:$48 sps:$4 sm:$0xff]  }
  0x7c   : > { %2146 = vmatprep.subr.bf16.mxu1 %v6004_v10  ;;  %v6014_v17 = vld [vmem:[#allocation5 + $0x124] ss:$48 sps:$4 sm:$0xff]   ;;  %v6018_v19 = vld [vmem:[#allocation5 + $0x120] ss:$48 sps:$4 sm:$0xff]   ;;  %v6061_v47 = vld [vmem:[#allocation5 + $0x18c] ss:$48 sps:$4 sm:$0xff]  }
  0x7d   : > { %v6016_v18 = vld [vmem:[#allocation5 + $0x724] ss:$48 sps:$4 sm:$0xff]   ;;  %v6019_v20 = vld [vmem:[#allocation5 + $0x720] ss:$48 sps:$4 sm:$0xff]   ;;  %v6059_v48 = vld [vmem:[#allocation5 + $0x188] ss:$48 sps:$4 sm:$0xff]  }
  0x7e   : > { %2106 = vmatpush1.bf16.msra.mxu0 %v6006_v11  ;;  %v6020_v21 = vld [vmem:[#allocation5 + $0xc4] ss:$48 sps:$4 sm:$0xff]   ;;  %v6024_v23 = vld [vmem:[#allocation5 + $0xc0] ss:$48 sps:$4 sm:$0xff]   ;;  %v6067_v53 = vld [vmem:[#allocation5 + $0x12c] ss:$48 sps:$4 sm:$0xff]  }
  0x7f   : > { %2147 = vmatpush1.bf16.msra.mxu1 %v6007_v12  ;;  %2107 = vmatprep.subr.bf16.mxu0 %v6008_v13  ;;  %v6022_v22 = vld [vmem:[#allocation5 + $0x6c4] ss:$48 sps:$4 sm:$0xff]   ;;  %v6025_v24 = vld [vmem:[#allocation5 + $0x6c0] ss:$48 sps:$4 sm:$0xff]   ;;  %v6065_v54 = vld [vmem:[#allocation5 + $0x128] ss:$48 sps:$4 sm:$0xff]  }
  0x80   : > { %2148 = vmatprep.subr.bf16.mxu1 %v6010_v14  ;;  %v6026_v25 = vld [vmem:[#allocation5 + $0x64] ss:$48 sps:$4 sm:$0xff]   ;;  %v6030_v27 = vld [vmem:[#allocation5 + $0x60] ss:$48 sps:$4 sm:$0xff]   ;;  %v6073_v57 = vld [vmem:[#allocation5 + $0xcc] ss:$48 sps:$4 sm:$0xff]  }
  0x81   : > { %v6028_v26 = vld [vmem:[#allocation5 + $0x664] ss:$48 sps:$4 sm:$0xff]   ;;  %v6031_v28 = vld [vmem:[#allocation5 + $0x660] ss:$48 sps:$4 sm:$0xff]   ;;  %v6071_v58 = vld [vmem:[#allocation5 + $0xc8] ss:$48 sps:$4 sm:$0xff]  }
  0x82   : > { %2108 = vmatpush1.bf16.msra.mxu0 %v6012_v15  ;;  %v6032_v29 = vld [vmem:[#allocation5 + $0x4] ss:$48 sps:$4 sm:$0xff]   ;;  %v6036_v31 = vld [vmem:[#allocation5] ss:$48 sps:$4 sm:$0xff]   ;;  %v6079_v61 = vld [vmem:[#allocation5 + $0x6c] ss:$48 sps:$4 sm:$0xff]  }
  0x83   : > { %2149 = vmatpush1.bf16.msra.mxu1 %v6013_v16  ;;  %2109 = vmatprep.subr.bf16.mxu0 %v6014_v17  ;;  %v6034_v30 = vld [vmem:[#allocation5 + $0x604] ss:$48 sps:$4 sm:$0xff]   ;;  %v6037_v32 = vld [vmem:[#allocation5 + $0x600] ss:$48 sps:$4 sm:$0xff]   ;;  %v6077_v62 = vld [vmem:[#allocation5 + $0x68] ss:$48 sps:$4 sm:$0xff]  }
  0x84   : > { %2150 = vmatprep.subr.bf16.mxu1 %v6016_v18  ;;  %v6038_v33 = vld [vmem:[#allocation5 + $0x5a4] ss:$48 sps:$4 sm:$0xff]   ;;  %v7220_v35 = vld [vmem:[%s7204_s9 + $0x8] ss:$0 sps:$4 sm:$0xff]   ;;  %v6083_v3 = vld [vmem:[#allocation5 + $0x8] ss:$48 sps:$4 sm:$0xff]  }
  0x85   : > { %v6044_v37 = vld [vmem:[#allocation5 + $0x5a0] ss:$48 sps:$4 sm:$0xff]   ;;  %v6045_v38 = vld [vmem:[#allocation5 + $0x544] ss:$48 sps:$4 sm:$0xff]   ;;  %v6085_v2 = vld [vmem:[#allocation5 + $0xc] ss:$48 sps:$4 sm:$0xff]  }
  0x86   : > { %2110 = vmatpush1.bf16.msra.mxu0 %v6018_v19  ;;  %v6050_v41 = vld [vmem:[#allocation5 + $0x540] ss:$48 sps:$4 sm:$0xff]   ;;  %v6051_v42 = vld [vmem:[#allocation5 + $0x4e4] ss:$48 sps:$4 sm:$0xff]   ;;  %v6091_v5 = vld [vmem:[#allocation5 + $0x5ac] ss:$48 sps:$4 sm:$0xff]  }
  0x87   : > { %2151 = vmatpush1.bf16.msra.mxu1 %v6019_v20  ;;  %2111 = vmatprep.subr.bf16.mxu0 %v6020_v21  ;;  %v6056_v45 = vld [vmem:[#allocation5 + $0x4e0] ss:$48 sps:$4 sm:$0xff]   ;;  %v6057_v46 = vld [vmem:[#allocation5 + $0x484] ss:$48 sps:$4 sm:$0xff]   ;;  %v6094_v6 = vld [vmem:[#allocation5 + $0x8ac] ss:$48 sps:$4 sm:$0xff]  }
  0x88   : > { %2152 = vmatprep.subr.bf16.mxu1 %v6022_v22  ;;  %v296_v49 = vld [vmem:[%s7204_s9] sm:$0xff]  ;;  %v6062_v50 = vld [vmem:[#allocation5 + $0x480] ss:$48 sps:$4 sm:$0xff]   ;;  %s7386_s11 = scalar_lea.vmem [#allocation11], %s5896_s25  ;;  %s5897_s17 = smul.u32 384, %s7079_s24 }
  0x89   : > { %v6063_v51 = vld [vmem:[#allocation5 + $0x424] ss:$48 sps:$4 sm:$0xff]   ;;  %v7224_v52 = vcombine.high %v296_v49, %v296_v49  ;;  %v6068_v55 = vld [vmem:[#allocation5 + $0x420] ss:$48 sps:$4 sm:$0xff]   ;;  %v7228_v7 = vcombine.low %v296_v49, %v296_v49  ;;  %v6089_v8 = vld [vmem:[#allocation5 + $0x5a8] ss:$48 sps:$4 sm:$0xff]  }
  0x8a   : > { %2112 = vmatpush1.bf16.msra.mxu0 %v6024_v23  ;;  %v6069_v56 = vld [vmem:[#allocation5 + $0x3c4] ss:$48 sps:$4 sm:$0xff]   ;;  %v6074_v59 = vld [vmem:[#allocation5 + $0x3c0] ss:$48 sps:$4 sm:$0xff]   ;;  %v6092_v9 = vld [vmem:[#allocation5 + $0x8a8] ss:$48 sps:$4 sm:$0xff]   ;;  %s7397_s22 = scalar_lea.hbm %s7440_s5, %s5897_s17 }
  0x8b   : > { %2153 = vmatpush1.bf16.msra.mxu1 %v6025_v24  ;;  %2113 = vmatprep.subr.bf16.mxu0 %v6026_v25  ;;  %v6075_v60 = vld [vmem:[#allocation5 + $0x364] ss:$48 sps:$4 sm:$0xff]   ;;  %v6080_v63 = vld [vmem:[#allocation5 + $0x360] ss:$48 sps:$4 sm:$0xff]   ;;  %v6097_v10 = vld [vmem:[#allocation5 + $0x54c] ss:$48 sps:$4 sm:$0xff]  }
  0x8c   : > { %2154 = vmatprep.subr.bf16.mxu1 %v6028_v26  ;;  %2133 = vmatprep.mubr.bf16.mxu0 %v7224_v52  ;;  %v6081_v1 = vld [vmem:[#allocation5 + $0x304] ss:$48 sps:$4 sm:$0xff]   ;;  %v6086_v4 = vld [vmem:[#allocation5 + $0x300] ss:$48 sps:$4 sm:$0xff]   ;;  %v6100_v11 = vld [vmem:[#allocation5 + $0x84c] ss:$48 sps:$4 sm:$0xff]  }
  0x8d   : > { %v6095_v12 = vld [vmem:[#allocation5 + $0x548] ss:$48 sps:$4 sm:$0xff]   ;;  %v6103_v14 = vld [vmem:[#allocation5 + $0x4ec] ss:$48 sps:$4 sm:$0xff]   ;;  %v6149_v49 = vld [vmem:[#allocation5 + $0x1f0] ss:$48 sps:$4 sm:$0xff]  }
  0x8e   : > { %2114 = vmatpush1.bf16.msra.mxu0 %v6030_v27  ;;  %v6098_v13 = vld [vmem:[#allocation5 + $0x848] ss:$48 sps:$4 sm:$0xff]   ;;  %v6106_v15 = vld [vmem:[#allocation5 + $0x7ec] ss:$48 sps:$4 sm:$0xff]   ;;  %s5058_s26 = sshll.u32 %s7386_s11, 4  ;;  %s5044_s16 = scalar_lea.sflag [#allocation4], %s7200_s7  ;;  %s5059_s26 = int_to_ptr.vmem [resolvable:$true] %s5058_s26 }
  0x8f   : > { %2155 = vmatpush1.bf16.msra.mxu1 %v6031_v28  ;;  %2115 = vmatprep.subr.bf16.mxu0 %v6032_v29  ;;  %v6101_v16 = vld [vmem:[#allocation5 + $0x4e8] ss:$48 sps:$4 sm:$0xff]   ;;  %v6109_v18 = vld [vmem:[#allocation5 + $0x48c] ss:$48 sps:$4 sm:$0xff]   ;;  %s6943_s15 = scalar_lea.vmem %s5059_s26, 384  ;;  %p7457_p7 = scmp.ne.s32.totalorder %s7448_s13, 0 }
  0x90   : > { %2156 = vmatprep.subr.bf16.mxu1 %v6034_v30  ;;  %v6104_v17 = vld [vmem:[#allocation5 + $0x7e8] ss:$48 sps:$4 sm:$0xff]   ;;  %v6112_v19 = vld [vmem:[#allocation5 + $0x78c] ss:$48 sps:$4 sm:$0xff]   ;;  %p6944_p8 = scmp.ne.s32.totalorder %s5059_s26, %s6943_s15  ;;  %s7027_s24 = smov [#allocation11]  }
  0x91   : > { %v6107_v20 = vld [vmem:[#allocation5 + $0x488] ss:$48 sps:$4 sm:$0xff]   ;;  %v6115_v22 = vld [vmem:[#allocation5 + $0x42c] ss:$48 sps:$4 sm:$0xff]   ;;  %s6947_s12 = sshll.u32 %s7027_s24, 4  ;;  %s6948_s12 = int_to_ptr.vmem [resolvable:$false] %s6947_s12 }
  0x92   : > { %2116 = vmatpush1.bf16.msra.mxu0 %v6036_v31  ;;  %v6110_v21 = vld [vmem:[#allocation5 + $0x788] ss:$48 sps:$4 sm:$0xff]   ;;  %v6118_v23 = vld [vmem:[#allocation5 + $0x72c] ss:$48 sps:$4 sm:$0xff]   ;;  %p6945_p10 = pnand %p6944_p8, %p7457_p7  ;;  %s6949_s23 = scalar_lea.vmem %s6948_s12, 768 }
  0x93   : > { %2157 = vmatpush1.bf16.msra.mxu1 %v6037_v32  ;;  %2117 = vmatprep.subr.bf16.mxu0 %v6038_v33  ;;  %v6113_v24 = vld [vmem:[#allocation5 + $0x428] ss:$48 sps:$4 sm:$0xff]   ;;  %v6121_v26 = vld [vmem:[#allocation5 + $0x3cc] ss:$48 sps:$4 sm:$0xff]   ;;  %p6950_p0 = scmp.lt.s32.totalorder %s5059_s26, %s6948_s12  ;;  %p6951_p2 = scmp.lt.s32.totalorder %s6949_s23, %s6943_s15 }
  0x94   : > { %2183 = vmatprep.subr.bf16.mxu1 %v6043_v34  ;;  %v6116_v25 = vld [vmem:[#allocation5 + $0x728] ss:$48 sps:$4 sm:$0xff]   ;;  %v6124_v27 = vld [vmem:[#allocation5 + $0x6cc] ss:$48 sps:$4 sm:$0xff]   ;;  %p6946_p6 = pneg %p6945_p10 }
  0x95   : > { %v6119_v28 = vld [vmem:[#allocation5 + $0x3c8] ss:$48 sps:$4 sm:$0xff]   ;;  %v6127_v30 = vld [vmem:[#allocation5 + $0x36c] ss:$48 sps:$4 sm:$0xff]   ;;  %p6952_p9 = por %p6951_p2, %p6950_p0 }
  0x96   : > { %2175 = vmatmul.mubr.bf16.vlgmr.msra.gmra.mxu1 %v7220_v35  ;;  %2118 = vmatpush2.bf16.msra.mxu0 %v6044_v37  ;;  %v6122_v29 = vld [vmem:[#allocation5 + $0x6c8] ss:$48 sps:$4 sm:$0xff]   ;;  %v6130_v31 = vld [vmem:[#allocation5 + $0x66c] ss:$48 sps:$4 sm:$0xff]  }
  0x97   : > { %2184 = vmatpush1.bf16.msra.mxu1 %v6041_v36  ;;  %2119 = vmatprep.subr.bf16.mxu0 %v6045_v38  ;;  %v6125_v32 = vld [vmem:[#allocation5 + $0x368] ss:$48 sps:$4 sm:$0xff]   ;;  %v6133_v34 = vld [vmem:[#allocation5 + $0x30c] ss:$48 sps:$4 sm:$0xff]   ;;  %p6953_p11 = pnand %p6952_p9, %p6946_p6 }
  0x98   : > { %2185 = vmatprep.subr.bf16.mxu1 %v6049_v39  ;;  %2215 = vmatprep.mubr.bf16.mxu1 %v7224_v52  ;;  %v6128_v33 = vld [vmem:[#allocation5 + $0x668] ss:$48 sps:$4 sm:$0xff]   ;;  %v6136_v36 = vld [vmem:[#allocation5 + $0x60c] ss:$48 sps:$4 sm:$0xff]   ;;  %v6139_v39 = vld [vmem:[#allocation5 + $0x2b4] ss:$48 sps:$4 sm:$0xff]  }
  0x99   : > { %v6131_v37 = vld [vmem:[#allocation5 + $0x308] ss:$48 sps:$4 sm:$0xff]  }
  0x9a   : > { %2120 = vmatpush2.bf16.msra.mxu0 %v6050_v41  ;;  %v6134_v38 = vld [vmem:[#allocation5 + $0x608] ss:$48 sps:$4 sm:$0xff]   ;;  %v6137_v41 = vld [vmem:[#allocation5 + $0x2b0] ss:$48 sps:$4 sm:$0xff]  }
  0x9b   : > { %2186 = vmatpush1.bf16.msra.mxu1 %v6047_v40  ;;  %2121 = vmatprep.subr.bf16.mxu0 %v6051_v42  ;;  %v6142_v40 = vld [vmem:[#allocation5 + $0x8b4] ss:$48 sps:$4 sm:$0xff]   ;;  %v6140_v42 = vld [vmem:[#allocation5 + $0x8b0] ss:$48 sps:$4 sm:$0xff]  }
  0x9c   : > { %2187 = vmatprep.subr.bf16.mxu1 %v6055_v43  ;;  %v6145_v43 = vld [vmem:[#allocation5 + $0x254] ss:$48 sps:$4 sm:$0xff]  }
  0x9e   : > { %2122 = vmatpush2.bf16.msra.mxu0 %v6056_v45  ;;  %v6143_v45 = vld [vmem:[#allocation5 + $0x250] ss:$48 sps:$4 sm:$0xff]  }
  0x9f   : > { %2188 = vmatpush1.bf16.msra.mxu1 %v6053_v44  ;;  %2123 = vmatprep.subr.bf16.mxu0 %v6057_v46  ;;  %v6148_v44 = vld [vmem:[#allocation5 + $0x854] ss:$48 sps:$4 sm:$0xff]   ;;  %v6146_v46 = vld [vmem:[#allocation5 + $0x850] ss:$48 sps:$4 sm:$0xff]  }
  0xa0   : > { %2189 = vmatprep.subr.bf16.mxu1 %v6061_v47  ;;  %v6151_v47 = vld [vmem:[#allocation5 + $0x1f4] ss:$48 sps:$4 sm:$0xff]  }
  0xa2   : > { %2124 = vmatpush2.bf16.msra.mxu0 %v6062_v50  ;;  %v6152_v50 = vld [vmem:[#allocation5 + $0x7f0] ss:$48 sps:$4 sm:$0xff]  }
  0xa3   : > { %2190 = vmatpush1.bf16.msra.mxu1 %v6059_v48  ;;  %2125 = vmatprep.subr.bf16.mxu0 %v6063_v51  ;;  %v6154_v48 = vld [vmem:[#allocation5 + $0x7f4] ss:$48 sps:$4 sm:$0xff]  }
  0xa4   : > { %2191 = vmatprep.subr.bf16.mxu1 %v6067_v53  ;;  %v6157_v51 = vld [vmem:[#allocation5 + $0x194] ss:$48 sps:$4 sm:$0xff]  }
  0xa5   : > { %v6160_v53 = vld [vmem:[#allocation5 + $0x794] ss:$48 sps:$4 sm:$0xff]  }
  0xa6   : > { %2126 = vmatpush2.bf16.msra.mxu0 %v6068_v55  ;;  %v6158_v55 = vld [vmem:[#allocation5 + $0x790] ss:$48 sps:$4 sm:$0xff]  }
  0xa7   : > { %2192 = vmatpush1.bf16.msra.mxu1 %v6065_v54  ;;  %2127 = vmatprep.subr.bf16.mxu0 %v6069_v56  ;;  %v6155_v54 = vld [vmem:[#allocation5 + $0x190] ss:$48 sps:$4 sm:$0xff]   ;;  %v6163_v56 = vld [vmem:[#allocation5 + $0x134] ss:$48 sps:$4 sm:$0xff]  }
  0xa8   : > { %2193 = vmatprep.subr.bf16.mxu1 %v6073_v57  ;;  %v6166_v57 = vld [vmem:[#allocation5 + $0x734] ss:$48 sps:$4 sm:$0xff]  }
  0xaa   : > { %2128 = vmatpush2.bf16.msra.mxu0 %v6074_v59  ;;  %v6164_v59 = vld [vmem:[#allocation5 + $0x730] ss:$48 sps:$4 sm:$0xff]  }
  0xab   : > { %2194 = vmatpush1.bf16.msra.mxu1 %v6071_v58  ;;  %2129 = vmatprep.subr.bf16.mxu0 %v6075_v60  ;;  %v6161_v58 = vld [vmem:[#allocation5 + $0x130] ss:$48 sps:$4 sm:$0xff]   ;;  %v6169_v60 = vld [vmem:[#allocation5 + $0xd4] ss:$48 sps:$4 sm:$0xff]  }
  0xac   : > { %2195 = vmatprep.subr.bf16.mxu1 %v6079_v61  ;;  %v6172_v61 = vld [vmem:[#allocation5 + $0x6d4] ss:$48 sps:$4 sm:$0xff]  }
  0xae   : > { %2130 = vmatpush2.bf16.msra.mxu0 %v6080_v63  ;;  %v6170_v63 = vld [vmem:[#allocation5 + $0x6d0] ss:$48 sps:$4 sm:$0xff]  }
  0xaf   : > { %2196 = vmatpush1.bf16.msra.mxu1 %v6077_v62  ;;  %2131 = vmatprep.subr.bf16.mxu0 %v6081_v1  ;;  %v6167_v62 = vld [vmem:[#allocation5 + $0xd0] ss:$48 sps:$4 sm:$0xff]   ;;  %v6175_v1 = vld [vmem:[#allocation5 + $0x74] ss:$48 sps:$4 sm:$0xff]  }
  0xb0   : > { %2197 = vmatprep.subr.bf16.mxu1 %v6085_v2  ;;  %v6178_v2 = vld [vmem:[#allocation5 + $0x674] ss:$48 sps:$4 sm:$0xff]  }
  0xb2   : > { %2132 = vmatpush2.bf16.msra.mxu0 %v6086_v4  ;;  %v6176_v4 = vld [vmem:[#allocation5 + $0x670] ss:$48 sps:$4 sm:$0xff]  }
  0xb3   : > { %2198 = vmatpush1.bf16.msra.mxu1 %v6083_v3  ;;  %2224 = vmatprep.subr.bf16.mxu0 %v6094_v6  ;;  %v6173_v3 = vld [vmem:[#allocation5 + $0x70] ss:$48 sps:$4 sm:$0xff]   ;;  %v6184_v6 = vld [vmem:[#allocation5 + $0x614] ss:$48 sps:$4 sm:$0xff]  }
  0xb4   : > { %2199 = vmatprep.subr.bf16.mxu1 %v6091_v5  ;;  %v6181_v5 = vld [vmem:[#allocation5 + $0x14] ss:$48 sps:$4 sm:$0xff]  }
  0xb5   : > { %2134 = vmatmul.mubr.bf16.vlgmr.msra.gmra.mxu0 %v7228_v7 }
  0xb6   : > { %2225 = vmatpush1.bf16.msra.mxu0 %v6092_v9  ;;  %2256 = vmatprep.mubr.bf16.mxu0 %v7026_v0  ;;  %v6182_v9 = vld [vmem:[#allocation5 + $0x610] ss:$48 sps:$4 sm:$0xff]  }
  0xb7   : > { %2200 = vmatpush2.bf16.msra.mxu1 %v6089_v8  ;;  %2226 = vmatprep.subr.bf16.mxu0 %v6100_v11  ;;  %v6179_v8 = vld [vmem:[#allocation5 + $0x10] ss:$48 sps:$4 sm:$0xff]   ;;  %v6190_v11 = vld [vmem:[#allocation5 + $0x2bc] ss:$48 sps:$4 sm:$0xff]  }
  0xb8   : > { %2201 = vmatprep.subr.bf16.mxu1 %v6097_v10  ;;  %v6187_v10 = vld [vmem:[#allocation5 + $0x5b4] ss:$48 sps:$4 sm:$0xff]  }
  0xba   : > { %2227 = vmatpush1.bf16.msra.mxu0 %v6098_v13  ;;  %v6188_v13 = vld [vmem:[#allocation5 + $0x2b8] ss:$48 sps:$4 sm:$0xff]  }
  0xbb   : > { %2202 = vmatpush2.bf16.msra.mxu1 %v6095_v12  ;;  %2228 = vmatprep.subr.bf16.mxu0 %v6106_v15  ;;  %v6185_v12 = vld [vmem:[#allocation5 + $0x5b0] ss:$48 sps:$4 sm:$0xff]   ;;  %v6196_v15 = vld [vmem:[#allocation5 + $0x25c] ss:$48 sps:$4 sm:$0xff]  }
  0xbc   : > { %2203 = vmatprep.subr.bf16.mxu1 %v6103_v14  ;;  %v6193_v14 = vld [vmem:[#allocation5 + $0x554] ss:$48 sps:$4 sm:$0xff]  }
  0xbe   : > { %2229 = vmatpush1.bf16.msra.mxu0 %v6104_v17  ;;  %v6194_v17 = vld [vmem:[#allocation5 + $0x258] ss:$48 sps:$4 sm:$0xff]  }
  0xbf   : > { %2204 = vmatpush2.bf16.msra.mxu1 %v6101_v16  ;;  %2230 = vmatprep.subr.bf16.mxu0 %v6112_v19  ;;  %v6191_v16 = vld [vmem:[#allocation5 + $0x550] ss:$48 sps:$4 sm:$0xff]   ;;  %v6202_v19 = vld [vmem:[#allocation5 + $0x1fc] ss:$48 sps:$4 sm:$0xff]  }
  0xc0   : > { %2205 = vmatprep.subr.bf16.mxu1 %v6109_v18  ;;  %v6199_v18 = vld [vmem:[#allocation5 + $0x4f4] ss:$48 sps:$4 sm:$0xff]  }
  0xc2   : > { %2231 = vmatpush1.bf16.msra.mxu0 %v6110_v21  ;;  %v6200_v21 = vld [vmem:[#allocation5 + $0x1f8] ss:$48 sps:$4 sm:$0xff]  }
  0xc3   : > { %2206 = vmatpush2.bf16.msra.mxu1 %v6107_v20  ;;  %2232 = vmatprep.subr.bf16.mxu0 %v6118_v23  ;;  %v6197_v20 = vld [vmem:[#allocation5 + $0x4f0] ss:$48 sps:$4 sm:$0xff]   ;;  %v6208_v23 = vld [vmem:[#allocation5 + $0x19c] ss:$48 sps:$4 sm:$0xff]  }
  0xc4   : > { %2207 = vmatprep.subr.bf16.mxu1 %v6115_v22  ;;  %v6205_v22 = vld [vmem:[#allocation5 + $0x494] ss:$48 sps:$4 sm:$0xff]  }
  0xc6   : > { %2233 = vmatpush1.bf16.msra.mxu0 %v6116_v25  ;;  %v6211_v25 = vld [vmem:[#allocation5 + $0x434] ss:$48 sps:$4 sm:$0xff]  }
  0xc7   : > { %2208 = vmatpush2.bf16.msra.mxu1 %v6113_v24  ;;  %2234 = vmatprep.subr.bf16.mxu0 %v6124_v27  ;;  %v6203_v24 = vld [vmem:[#allocation5 + $0x490] ss:$48 sps:$4 sm:$0xff]  }
  0xc8   : > { %2209 = vmatprep.subr.bf16.mxu1 %v6121_v26  ;;  %v6214_v26 = vld [vmem:[#allocation5 + $0x13c] ss:$48 sps:$4 sm:$0xff]   ;;  %v6209_v27 = vld [vmem:[#allocation5 + $0x430] ss:$48 sps:$4 sm:$0xff]  }
  0xca   : > { %2235 = vmatpush1.bf16.msra.mxu0 %v6122_v29  ;;  %v6217_v29 = vld [vmem:[#allocation5 + $0x3d4] ss:$48 sps:$4 sm:$0xff]  }
  0xcb   : > { %2210 = vmatpush2.bf16.msra.mxu1 %v6119_v28  ;;  %2236 = vmatprep.subr.bf16.mxu0 %v6130_v31  ;;  %v6212_v28 = vld [vmem:[#allocation5 + $0x138] ss:$48 sps:$4 sm:$0xff]   ;;  %v6215_v31 = vld [vmem:[#allocation5 + $0x3d0] ss:$48 sps:$4 sm:$0xff]  }
  0xcc   : > { %2211 = vmatprep.subr.bf16.mxu1 %v6127_v30  ;;  %v6220_v30 = vld [vmem:[#allocation5 + $0xdc] ss:$48 sps:$4 sm:$0xff]  }
  0xce   : > { %2237 = vmatpush1.bf16.msra.mxu0 %v6128_v33  ;;  %v6223_v33 = vld [vmem:[#allocation5 + $0x374] ss:$48 sps:$4 sm:$0xff]  }
  0xcf   : > { %2212 = vmatpush2.bf16.msra.mxu1 %v6125_v32  ;;  %2238 = vmatprep.subr.bf16.mxu0 %v6136_v36  ;;  %v6218_v32 = vld [vmem:[#allocation5 + $0xd8] ss:$48 sps:$4 sm:$0xff]   ;;  %v6221_v36 = vld [vmem:[#allocation5 + $0x370] ss:$48 sps:$4 sm:$0xff]  }
  0xd0   : > { %2213 = vmatprep.subr.bf16.mxu1 %v6133_v34  ;;  %v6226_v34 = vld [vmem:[#allocation5 + $0x7c] ss:$48 sps:$4 sm:$0xff]  }
  0xd2   : > { %2239 = vmatpush1.bf16.msra.mxu0 %v6134_v38  ;;  %v6229_v38 = vld [vmem:[#allocation5 + $0x314] ss:$48 sps:$4 sm:$0xff]  }
  0xd3   : > { %2214 = vmatpush2.bf16.msra.mxu1 %v6131_v37  ;;  %2265 = vmatprep.subr.bf16.mxu0 %v6139_v39  ;;  %v6224_v37 = vld [vmem:[#allocation5 + $0x78] ss:$48 sps:$4 sm:$0xff]   ;;  %v6232_v39 = vld [vmem:[#allocation5 + $0x1c] ss:$48 sps:$4 sm:$0xff]  }
  0xd4   : > { %2306 = vmatprep.subr.bf16.mxu1 %v6142_v40  ;;  %v6227_v40 = vld [vmem:[#allocation5 + $0x310] ss:$48 sps:$4 sm:$0xff]  }
  0xd5   : > { %2257 = vmatmul.mubr.bf16.vlgmr.msra.gmra.mxu0 %v7220_v35 }
  0xd6   : > { %2216 = vmatmul.mubr.bf16.vlgmr.msra.gmra.mxu1 %v7228_v7  ;;  %2266 = vmatpush1.bf16.msra.mxu0 %v6137_v41  ;;  %v6230_v41 = vld [vmem:[#allocation5 + $0x18] ss:$48 sps:$4 sm:$0xff]  }
  0xd7   : > { %2307 = vmatpush1.bf16.msra.mxu1 %v6140_v42  ;;  %2267 = vmatprep.subr.bf16.mxu0 %v6145_v43  ;;  %v6235_v42 = vld [vmem:[#allocation5 + $0x5bc] ss:$48 sps:$4 sm:$0xff]  }
  0xd8   : > { %2308 = vmatprep.subr.bf16.mxu1 %v6148_v44  ;;  %2338 = vmatprep.mubr.bf16.mxu1 %v7026_v0  ;;  %v6238_v43 = vld [vmem:[#allocation5 + $0x8bc] ss:$48 sps:$4 sm:$0xff]   ;;  %v6233_v44 = vld [vmem:[#allocation5 + $0x5b8] ss:$48 sps:$4 sm:$0xff]  }
  0xd9   : > { %2297 = vmatprep.mubr.bf16.mxu0 %v7224_v52 }
  0xda   : > { %2268 = vmatpush1.bf16.msra.mxu0 %v6143_v45  ;;  %v6236_v45 = vld [vmem:[#allocation5 + $0x8b8] ss:$48 sps:$4 sm:$0xff]  }
  0xdb   : > { %2309 = vmatpush1.bf16.msra.mxu1 %v6146_v46  ;;  %2269 = vmatprep.subr.bf16.mxu0 %v6151_v47  ;;  %v6241_v46 = vld [vmem:[#allocation5 + $0x55c] ss:$48 sps:$4 sm:$0xff]  }
  0xdc   : > { %2310 = vmatprep.subr.bf16.mxu1 %v6154_v48  ;;  %v6244_v47 = vld [vmem:[#allocation5 + $0x85c] ss:$48 sps:$4 sm:$0xff]   ;;  %v6239_v48 = vld [vmem:[#allocation5 + $0x558] ss:$48 sps:$4 sm:$0xff]  }
  0xde   : > { %2270 = vmatpush1.bf16.msra.mxu0 %v6149_v49  ;;  %v6242_v49 = vld [vmem:[#allocation5 + $0x858] ss:$48 sps:$4 sm:$0xff]  }
  0xdf   : > { %2311 = vmatpush1.bf16.msra.mxu1 %v6152_v50  ;;  %2271 = vmatprep.subr.bf16.mxu0 %v6157_v51  ;;  %v6247_v50 = vld [vmem:[#allocation5 + $0x4fc] ss:$48 sps:$4 sm:$0xff]  }
  0xe0   : > { %2312 = vmatprep.subr.bf16.mxu1 %v6160_v53  ;;  %v6250_v51 = vld [vmem:[#allocation5 + $0x7fc] ss:$48 sps:$4 sm:$0xff]   ;;  %v6245_v53 = vld [vmem:[#allocation5 + $0x4f8] ss:$48 sps:$4 sm:$0xff]  }
  0xe2   : > { %2272 = vmatpush1.bf16.msra.mxu0 %v6155_v54  ;;  %v6248_v54 = vld [vmem:[#allocation5 + $0x7f8] ss:$48 sps:$4 sm:$0xff]  }
  0xe3   : > { %2313 = vmatpush1.bf16.msra.mxu1 %v6158_v55  ;;  %2273 = vmatprep.subr.bf16.mxu0 %v6163_v56  ;;  %v6253_v55 = vld [vmem:[#allocation5 + $0x49c] ss:$48 sps:$4 sm:$0xff]  }
  0xe4   : > { %2314 = vmatprep.subr.bf16.mxu1 %v6166_v57  ;;  %v6256_v56 = vld [vmem:[#allocation5 + $0x79c] ss:$48 sps:$4 sm:$0xff]   ;;  %v6251_v57 = vld [vmem:[#allocation5 + $0x498] ss:$48 sps:$4 sm:$0xff]  }
  0xe6   : > { %2274 = vmatpush1.bf16.msra.mxu0 %v6161_v58  ;;  %v6254_v58 = vld [vmem:[#allocation5 + $0x798] ss:$48 sps:$4 sm:$0xff]  }
  0xe7   : > { %2315 = vmatpush1.bf16.msra.mxu1 %v6164_v59  ;;  %2275 = vmatprep.subr.bf16.mxu0 %v6169_v60  ;;  %v6259_v59 = vld [vmem:[#allocation5 + $0x43c] ss:$48 sps:$4 sm:$0xff]  }
  0xe8   : > { %2316 = vmatprep.subr.bf16.mxu1 %v6172_v61  ;;  %v6262_v60 = vld [vmem:[#allocation5 + $0x73c] ss:$48 sps:$4 sm:$0xff]   ;;  %v6257_v61 = vld [vmem:[#allocation5 + $0x438] ss:$48 sps:$4 sm:$0xff]  }
  0xea   : > { %2276 = vmatpush1.bf16.msra.mxu0 %v6167_v62  ;;  %v6260_v62 = vld [vmem:[#allocation5 + $0x738] ss:$48 sps:$4 sm:$0xff]  }
  0xeb   : > { %2317 = vmatpush1.bf16.msra.mxu1 %v6170_v63  ;;  %2277 = vmatprep.subr.bf16.mxu0 %v6175_v1  ;;  %v6265_v63 = vld [vmem:[#allocation5 + $0x3dc] ss:$48 sps:$4 sm:$0xff]  }
  0xec   : > { %2318 = vmatprep.subr.bf16.mxu1 %v6178_v2  ;;  %v6268_v1 = vld [vmem:[#allocation5 + $0x6dc] ss:$48 sps:$4 sm:$0xff]   ;;  %v6263_v2 = vld [vmem:[#allocation5 + $0x3d8] ss:$48 sps:$4 sm:$0xff]  }
  0xee   : > { %2278 = vmatpush1.bf16.msra.mxu0 %v6173_v3  ;;  %v6266_v3 = vld [vmem:[#allocation5 + $0x6d8] ss:$48 sps:$4 sm:$0xff]  }
  0xef   : > { %2319 = vmatpush1.bf16.msra.mxu1 %v6176_v4  ;;  %2279 = vmatprep.subr.bf16.mxu0 %v6181_v5  ;;  %v6271_v4 = vld [vmem:[#allocation5 + $0x37c] ss:$48 sps:$4 sm:$0xff]  }
  0xf0   : > { %2320 = vmatprep.subr.bf16.mxu1 %v6184_v6  ;;  %v6274_v5 = vld [vmem:[#allocation5 + $0x67c] ss:$48 sps:$4 sm:$0xff]   ;;  %v6269_v6 = vld [vmem:[#allocation5 + $0x378] ss:$48 sps:$4 sm:$0xff]  }
  0xf2   : > { %2280 = vmatpush1.bf16.msra.mxu0 %v6179_v8  ;;  %v6272_v8 = vld [vmem:[#allocation5 + $0x678] ss:$48 sps:$4 sm:$0xff]  }
  0xf3   : > { %2321 = vmatpush1.bf16.msra.mxu1 %v6182_v9  ;;  %2281 = vmatprep.subr.bf16.mxu0 %v6187_v10  ;;  %v6277_v9 = vld [vmem:[#allocation5 + $0x31c] ss:$48 sps:$4 sm:$0xff]  }
  0xf4   : > { %2347 = vmatprep.subr.bf16.mxu1 %v6190_v11  ;;  %v6280_v10 = vld [vmem:[#allocation5 + $0x61c] ss:$48 sps:$4 sm:$0xff]   ;;  %v6275_v11 = vld [vmem:[#allocation5 + $0x318] ss:$48 sps:$4 sm:$0xff]  }
  0xf6   : > { %2339 = vmatmul.mubr.bf16.vlgmr.msra.gmra.mxu1 %v7220_v35  ;;  %2282 = vmatpush2.bf16.msra.mxu0 %v6185_v12  ;;  %v6206_v35 = vld [vmem:[#allocation5 + $0x198] ss:$48 sps:$4 sm:$0xff]  }
  0xf7   : > { %2348 = vmatpush1.bf16.msra.mxu1 %v6188_v13  ;;  %2283 = vmatprep.subr.bf16.mxu0 %v6193_v14  ;;  %v6278_v12 = vld [vmem:[#allocation5 + $0x618] ss:$48 sps:$4 sm:$0xff]   ;;  %v6283_v13 = vld [vmem:[#allocation5 + $0x2c4] ss:$48 sps:$4 sm:$0xff]  }
  0xf8   : > { %2349 = vmatprep.subr.bf16.mxu1 %v6196_v15  ;;  %2379 = vmatprep.mubr.bf16.mxu1 %v7224_v52  ;;  %v6286_v14 = vld [vmem:[#allocation5 + $0x8c4] ss:$48 sps:$4 sm:$0xff]   ;;  %v6281_v15 = vld [vmem:[#allocation5 + $0x2c0] ss:$48 sps:$4 sm:$0xff]  }
  0xfa   : > { %2284 = vmatpush2.bf16.msra.mxu0 %v6191_v16  ;;  %v6284_v16 = vld [vmem:[#allocation5 + $0x8c0] ss:$48 sps:$4 sm:$0xff]  }
  0xfb   : > { %2350 = vmatpush1.bf16.msra.mxu1 %v6194_v17  ;;  %2285 = vmatprep.subr.bf16.mxu0 %v6199_v18  ;;  %v6289_v17 = vld [vmem:[#allocation5 + $0x264] ss:$48 sps:$4 sm:$0xff]  }
  0xfc   : > { %2351 = vmatprep.subr.bf16.mxu1 %v6202_v19  ;;  %v6292_v18 = vld [vmem:[#allocation5 + $0x864] ss:$48 sps:$4 sm:$0xff]   ;;  %v7242_v19 = vld [vmem:[%s7204_s9 + $0x8] ss:$0 sps:$4 sm:$0xff]  }
  0xfe   : > { %2286 = vmatpush2.bf16.msra.mxu0 %v6197_v20  ;;  %v6287_v20 = vld [vmem:[#allocation5 + $0x260] ss:$48 sps:$4 sm:$0xff]  }
  0xff   : > { %2352 = vmatpush1.bf16.msra.mxu1 %v6200_v21  ;;  %2287 = vmatprep.subr.bf16.mxu0 %v6205_v22  ;;  %v6290_v21 = vld [vmem:[#allocation5 + $0x860] ss:$48 sps:$4 sm:$0xff]   ;;  %v6295_v22 = vld [vmem:[#allocation5 + $0x204] ss:$48 sps:$4 sm:$0xff]  }
 0x100   : > { %2353 = vmatprep.subr.bf16.mxu1 %v6208_v23  ;;  %v6298_v23 = vld [vmem:[#allocation5 + $0x804] ss:$48 sps:$4 sm:$0xff]  }
 0x102   : > { %2288 = vmatpush2.bf16.msra.mxu0 %v6203_v24  ;;  %v6293_v24 = vld [vmem:[#allocation5 + $0x200] ss:$48 sps:$4 sm:$0xff]  }
 0x103   : > { %2354 = vmatpush1.bf16.msra.mxu1 %v6206_v35  ;;  %2289 = vmatprep.subr.bf16.mxu0 %v6211_v25  ;;  %v6296_v35 = vld [vmem:[#allocation5 + $0x800] ss:$48 sps:$4 sm:$0xff]   ;;  %v6301_v25 = vld [vmem:[#allocation5 + $0x1a4] ss:$48 sps:$4 sm:$0xff]  }
 0x104   : > { %2355 = vmatprep.subr.bf16.mxu1 %v6214_v26  ;;  %v6304_v26 = vld [vmem:[#allocation5 + $0x7a4] ss:$48 sps:$4 sm:$0xff]  }
 0x106   : > { %2290 = vmatpush2.bf16.msra.mxu0 %v6209_v27  ;;  %v6299_v27 = vld [vmem:[#allocation5 + $0x1a0] ss:$48 sps:$4 sm:$0xff]  }
 0x107   : > { %2356 = vmatpush1.bf16.msra.mxu1 %v6212_v28  ;;  %2291 = vmatprep.subr.bf16.mxu0 %v6217_v29  ;;  %v6302_v28 = vld [vmem:[#allocation5 + $0x7a0] ss:$48 sps:$4 sm:$0xff]   ;;  %v6307_v29 = vld [vmem:[#allocation5 + $0x144] ss:$48 sps:$4 sm:$0xff]  }
 0x108   : > { %2357 = vmatprep.subr.bf16.mxu1 %v6220_v30  ;;  %v6310_v30 = vld [vmem:[#allocation5 + $0x744] ss:$48 sps:$4 sm:$0xff]  }
 0x10a   : > { %2292 = vmatpush2.bf16.msra.mxu0 %v6215_v31  ;;  %v6305_v31 = vld [vmem:[#allocation5 + $0x140] ss:$48 sps:$4 sm:$0xff]  }
 0x10b   : > { %2358 = vmatpush1.bf16.msra.mxu1 %v6218_v32  ;;  %2293 = vmatprep.subr.bf16.mxu0 %v6223_v33  ;;  %v6308_v32 = vld [vmem:[#allocation5 + $0x740] ss:$48 sps:$4 sm:$0xff]   ;;  %v6313_v33 = vld [vmem:[#allocation5 + $0xe4] ss:$48 sps:$4 sm:$0xff]  }
 0x10c   : > { %2359 = vmatprep.subr.bf16.mxu1 %v6226_v34  ;;  %v6316_v34 = vld [vmem:[#allocation5 + $0x6e4] ss:$48 sps:$4 sm:$0xff]  }
 0x10e   : > { %2294 = vmatpush2.bf16.msra.mxu0 %v6221_v36  ;;  %v6311_v36 = vld [vmem:[#allocation5 + $0xe0] ss:$48 sps:$4 sm:$0xff]  }
 0x10f   : > { %2360 = vmatpush1.bf16.msra.mxu1 %v6224_v37  ;;  %2295 = vmatprep.subr.bf16.mxu0 %v6229_v38  ;;  %v6314_v37 = vld [vmem:[#allocation5 + $0x6e0] ss:$48 sps:$4 sm:$0xff]   ;;  %v6319_v38 = vld [vmem:[#allocation5 + $0x84] ss:$48 sps:$4 sm:$0xff]  }
 0x110   : > { %2361 = vmatprep.subr.bf16.mxu1 %v6232_v39  ;;  %v6322_v39 = vld [vmem:[#allocation5 + $0x684] ss:$48 sps:$4 sm:$0xff]  }
 0x112   : > { %2296 = vmatpush2.bf16.msra.mxu0 %v6227_v40  ;;  %v6317_v40 = vld [vmem:[#allocation5 + $0x80] ss:$48 sps:$4 sm:$0xff]  }
 0x113   : > { %2362 = vmatpush1.bf16.msra.mxu1 %v6230_v41  ;;  %2388 = vmatprep.subr.bf16.mxu0 %v6238_v43  ;;  %v6320_v41 = vld [vmem:[#allocation5 + $0x680] ss:$48 sps:$4 sm:$0xff]   ;;  %v6328_v43 = vld [vmem:[#allocation5 + $0x624] ss:$48 sps:$4 sm:$0xff]  }
 0x114   : > { %2363 = vmatprep.subr.bf16.mxu1 %v6235_v42  ;;  %v6325_v42 = vld [vmem:[#allocation5 + $0x24] ss:$48 sps:$4 sm:$0xff]  }
 0x115   : > { %2298 = vmatmul.mubr.bf16.vlgmr.msra.gmra.mxu0 %v7228_v7 }
 0x116   : > { %2389 = vmatpush1.bf16.msra.mxu0 %v6236_v45  ;;  %2420 = vmatprep.mubr.bf16.mxu0 %v7026_v0  ;;  %v6326_v45 = vld [vmem:[#allocation5 + $0x620] ss:$48 sps:$4 sm:$0xff]  }
 0x117   : > { %2364 = vmatpush2.bf16.msra.mxu1 %v6233_v44  ;;  %2390 = vmatprep.subr.bf16.mxu0 %v6244_v47  ;;  %v6323_v44 = vld [vmem:[#allocation5 + $0x20] ss:$48 sps:$4 sm:$0xff]   ;;  %v6334_v47 = vld [vmem:[#allocation5 + $0x2cc] ss:$48 sps:$4 sm:$0xff]  }
 0x118   : > { %2365 = vmatprep.subr.bf16.mxu1 %v6241_v46  ;;  %v6331_v46 = vld [vmem:[#allocation5 + $0x5c4] ss:$48 sps:$4 sm:$0xff]  }
 0x11a   : > { %2391 = vmatpush1.bf16.msra.mxu0 %v6242_v49  ;;  %v6332_v49 = vld [vmem:[#allocation5 + $0x2c8] ss:$48 sps:$4 sm:$0xff]  }
 0x11b   : > { %2366 = vmatpush2.bf16.msra.mxu1 %v6239_v48  ;;  %2392 = vmatprep.subr.bf16.mxu0 %v6250_v51  ;;  %v6329_v48 = vld [vmem:[#allocation5 + $0x5c0] ss:$48 sps:$4 sm:$0xff]   ;;  %v6340_v51 = vld [vmem:[#allocation5 + $0x26c] ss:$48 sps:$4 sm:$0xff]  }
 0x11c   : > { %2367 = vmatprep.subr.bf16.mxu1 %v6247_v50  ;;  %v6337_v50 = vld [vmem:[#allocation5 + $0x564] ss:$48 sps:$4 sm:$0xff]  }
 0x11e   : > { %2393 = vmatpush1.bf16.msra.mxu0 %v6248_v54  ;;  %v6335_v54 = vld [vmem:[#allocation5 + $0x560] ss:$48 sps:$4 sm:$0xff]  }
 0x11f   : > { %2368 = vmatpush2.bf16.msra.mxu1 %v6245_v53  ;;  %2394 = vmatprep.subr.bf16.mxu0 %v6256_v56  ;;  %v6343_v56 = vld [vmem:[#allocation5 + $0x504] ss:$48 sps:$4 sm:$0xff]  }
 0x120   : > { %2369 = vmatprep.subr.bf16.mxu1 %v6253_v55  ;;  %v6338_v55 = vld [vmem:[#allocation5 + $0x268] ss:$48 sps:$4 sm:$0xff]  }
 0x122   : > { %2395 = vmatpush1.bf16.msra.mxu0 %v6254_v58  ;;  %v6346_v58 = vld [vmem:[#allocation5 + $0x20c] ss:$48 sps:$4 sm:$0xff]  }
 0x123   : > { %2370 = vmatpush2.bf16.msra.mxu1 %v6251_v57  ;;  %2396 = vmatprep.subr.bf16.mxu0 %v6262_v60  ;;  %v6341_v60 = vld [vmem:[#allocation5 + $0x500] ss:$48 sps:$4 sm:$0xff]  }
 0x124   : > { %2371 = vmatprep.subr.bf16.mxu1 %v6259_v59 }
 0x126   : > { %2397 = vmatpush1.bf16.msra.mxu0 %v6260_v62  ;;  %v6349_v62 = vld [vmem:[#allocation5 + $0x4a4] ss:$48 sps:$4 sm:$0xff]  }
 0x127   : > { %2372 = vmatpush2.bf16.msra.mxu1 %v6257_v61  ;;  %2398 = vmatprep.subr.bf16.mxu0 %v6268_v1  ;;  %v6344_v61 = vld [vmem:[#allocation5 + $0x208] ss:$48 sps:$4 sm:$0xff]   ;;  %v6352_v1 = vld [vmem:[#allocation5 + $0x1ac] ss:$48 sps:$4 sm:$0xff]  }
 0x128   : > { %2373 = vmatprep.subr.bf16.mxu1 %v6265_v63 }
 0x12a   : > { %2399 = vmatpush1.bf16.msra.mxu0 %v6266_v3  ;;  %v6350_v3 = vld [vmem:[#allocation5 + $0x1a8] ss:$48 sps:$4 sm:$0xff]  }
 0x12b   : > { %2374 = vmatpush2.bf16.msra.mxu1 %v6263_v2  ;;  %2400 = vmatprep.subr.bf16.mxu0 %v6274_v5  ;;  %v6347_v2 = vld [vmem:[#allocation5 + $0x4a0] ss:$48 sps:$4 sm:$0xff]   ;;  %v6358_v5 = vld [vmem:[#allocation5 + $0x14c] ss:$48 sps:$4 sm:$0xff]  }
 0x12c   : > { %2375 = vmatprep.subr.bf16.mxu1 %v6271_v4  ;;  %v6355_v4 = vld [vmem:[#allocation5 + $0x444] ss:$48 sps:$4 sm:$0xff]  }
 0x12e   : > { %2401 = vmatpush1.bf16.msra.mxu0 %v6272_v8  ;;  %v6361_v8 = vld [vmem:[#allocation5 + $0x3e4] ss:$48 sps:$4 sm:$0xff]  }
 0x12f   : > { %2376 = vmatpush2.bf16.msra.mxu1 %v6269_v6  ;;  %2402 = vmatprep.subr.bf16.mxu0 %v6280_v10  ;;  %v6353_v6 = vld [vmem:[#allocation5 + $0x440] ss:$48 sps:$4 sm:$0xff]  }
 0x130   : > { %2377 = vmatprep.subr.bf16.mxu1 %v6277_v9  ;;  %v6364_v9 = vld [vmem:[#allocation5 + $0xec] ss:$48 sps:$4 sm:$0xff]   ;;  %v6359_v10 = vld [vmem:[#allocation5 + $0x3e0] ss:$48 sps:$4 sm:$0xff]  }
 0x132   : > { %2403 = vmatpush1.bf16.msra.mxu0 %v6278_v12  ;;  %v6367_v12 = vld [vmem:[#allocation5 + $0x384] ss:$48 sps:$4 sm:$0xff]  }
 0x133   : > { %2378 = vmatpush2.bf16.msra.mxu1 %v6275_v11  ;;  %2429 = vmatprep.subr.bf16.mxu0 %v6283_v13  ;;  %v6362_v11 = vld [vmem:[#allocation5 + $0xe8] ss:$48 sps:$4 sm:$0xff]   ;;  %v590_v13 = vlaneseq }
 0x134   : > { %2470 = vmatprep.subr.bf16.mxu1 %v6286_v14  ;;  %v6370_v14 = vld [vmem:[#allocation5 + $0x8c] ss:$48 sps:$4 sm:$0xff]  }
 0x135   : > { %2421 = vmatmul.mubr.bf16.vlgmr.msra.gmra.mxu0 %v7242_v19 }
 0x136   : > { %2380 = vmatmul.mubr.bf16.vlgmr.msra.gmra.mxu1 %v7228_v7  ;;  %2430 = vmatpush1.bf16.msra.mxu0 %v6281_v15  ;;  %v6365_v15 = vld [vmem:[#allocation5 + $0x380] ss:$48 sps:$4 sm:$0xff]  }
 0x137   : > { %2471 = vmatpush1.bf16.msra.mxu1 %v6284_v16  ;;  %2431 = vmatprep.subr.bf16.mxu0 %v6289_v17  ;;  %v6368_v16 = vld [vmem:[#allocation5 + $0x88] ss:$48 sps:$4 sm:$0xff]   ;;  %v6373_v17 = vld [vmem:[#allocation5 + $0x324] ss:$48 sps:$4 sm:$0xff]  }
 0x138   : > { %2472 = vmatprep.subr.bf16.mxu1 %v6292_v18  ;;  %2502 = vmatprep.mubr.bf16.mxu1 %v7026_v0  ;;  %v7253_v18 = vshrl.u32 %v590_v13, 7 }
 0x139   : > { %2461 = vmatprep.mubr.bf16.mxu0 %v7224_v52 }
 0x13a   : > { %2432 = vmatpush1.bf16.msra.mxu0 %v6287_v20  ;;  %v6376_v20 = vld [vmem:[#allocation5 + $0x2c] ss:$48 sps:$4 sm:$0xff]  }
 0x13b   : > { %2473 = vmatpush1.bf16.msra.mxu1 %v6290_v21  ;;  %2433 = vmatprep.subr.bf16.mxu0 %v6295_v22  ;;  %v6371_v21 = vld [vmem:[#allocation5 + $0x320] ss:$48 sps:$4 sm:$0xff]   ;;  %v6374_v22 = vld [vmem:[#allocation5 + $0x28] ss:$48 sps:$4 sm:$0xff]  }
 0x13c   : > { %2474 = vmatprep.subr.bf16.mxu1 %v6298_v23  ;;  %v7255_v23 = vld [vmem:[#allocation7] sm:$0xff] }
 0x13e   : > { %2434 = vmatpush1.bf16.msra.mxu0 %v6293_v24  ;;  %v7258_v24 = vsub.s32 0, %v7253_v18 }
 0x13f   : > { %2475 = vmatpush1.bf16.msra.mxu1 %v6296_v35  ;;  %2435 = vmatprep.subr.bf16.mxu0 %v6301_v25  ;;  %v6379_v35 = vld [vmem:[#allocation5 + $0x5cc] ss:$48 sps:$4 sm:$0xff]  }
 0x140   : > { %2476 = vmatprep.subr.bf16.mxu1 %v6304_v26  ;;  %v6382_v25 = vld [vmem:[#allocation5 + $0x8cc] ss:$48 sps:$4 sm:$0xff]   ;;  %v6377_v26 = vld [vmem:[#allocation5 + $0x5c8] ss:$48 sps:$4 sm:$0xff]  }
 0x142   : > { %2436 = vmatpush1.bf16.msra.mxu0 %v6299_v27  ;;  %v6380_v27 = vld [vmem:[#allocation5 + $0x8c8] ss:$48 sps:$4 sm:$0xff]  }
 0x143   : > { %2477 = vmatpush1.bf16.msra.mxu1 %v6302_v28  ;;  %2437 = vmatprep.subr.bf16.mxu0 %v6307_v29  ;;  %v593_v28 = vrot.slane %v7255_v23, %v7258_v24  ;;  %v6385_v29 = vld [vmem:[#allocation5 + $0x56c] ss:$48 sps:$4 sm:$0xff]  }
 0x144   : > { %2478 = vmatprep.subr.bf16.mxu1 %v6310_v30  ;;  %v6388_v30 = vld [vmem:[#allocation5 + $0x86c] ss:$48 sps:$4 sm:$0xff]  }
 0x146   : > { %2438 = vmatpush1.bf16.msra.mxu0 %v6305_v31  ;;  %v6383_v31 = vld [vmem:[#allocation5 + $0x568] ss:$48 sps:$4 sm:$0xff]  }
 0x147   : > { %2479 = vmatpush1.bf16.msra.mxu1 %v6308_v32  ;;  %2439 = vmatprep.subr.bf16.mxu0 %v6313_v33  ;;  %v6386_v33 = vld [vmem:[#allocation5 + $0x868] ss:$48 sps:$4 sm:$0xff]  }
 0x148   : > { %2480 = vmatprep.subr.bf16.mxu1 %v6316_v34  ;;  %v6391_v34 = vld [vmem:[#allocation5 + $0x50c] ss:$48 sps:$4 sm:$0xff]  }
 0x14a   : > { %2440 = vmatpush1.bf16.msra.mxu0 %v6311_v36  ;;  %v6394_v36 = vld [vmem:[#allocation5 + $0x80c] ss:$48 sps:$4 sm:$0xff]  }
 0x14b   : > { %2481 = vmatpush1.bf16.msra.mxu1 %v6314_v37  ;;  %2441 = vmatprep.subr.bf16.mxu0 %v6319_v38 }
 0x14c   : > { %2482 = vmatprep.subr.bf16.mxu1 %v6322_v39 }
 0x14e   : > { %2442 = vmatpush1.bf16.msra.mxu0 %v6317_v40  ;;  %v6389_v40 = vld [vmem:[#allocation5 + $0x508] ss:$48 sps:$4 sm:$0xff]  }
 0x14f   : > { %2483 = vmatpush1.bf16.msra.mxu1 %v6320_v41  ;;  %2443 = vmatprep.subr.bf16.mxu0 %v6325_v42  ;;  %v6392_v41 = vld [vmem:[#allocation5 + $0x808] ss:$48 sps:$4 sm:$0xff]  }
 0x150   : > { %2484 = vmatprep.subr.bf16.mxu1 %v6328_v43  ;;  %v6397_v43 = vld [vmem:[#allocation5 + $0x4ac] ss:$48 sps:$4 sm:$0xff]  }
 0x152   : > { %2444 = vmatpush1.bf16.msra.mxu0 %v6323_v44  ;;  %v6400_v44 = vld [vmem:[#allocation5 + $0x7ac] ss:$48 sps:$4 sm:$0xff]  }
 0x153   : > { %2485 = vmatpush1.bf16.msra.mxu1 %v6326_v45  ;;  %2445 = vmatprep.subr.bf16.mxu0 %v6331_v46  ;;  %v6395_v46 = vld [vmem:[#allocation5 + $0x4a8] ss:$48 sps:$4 sm:$0xff]  }
 0x154   : > { %2511 = vmatprep.subr.bf16.mxu1 %v6334_v47  ;;  %v6398_v47 = vld [vmem:[#allocation5 + $0x7a8] ss:$48 sps:$4 sm:$0xff]  }
 0x156   : > { %v7247_v53 = vpop.f32.mrf.mxu1  ;;  %2503 = vmatmul.mubr.bf16.vlgmr.msra.gmra.mxu1 %v7242_v19  ;;  %2446 = vmatpush2.bf16.msra.mxu0 %v6329_v48  ;;  %v6403_v48 = vld [vmem:[#allocation5 + $0x44c] ss:$48 sps:$4 sm:$0xff]  }
 0x157   : > { %2512 = vmatpush1.bf16.msra.mxu1 %v6332_v49  ;;  %2447 = vmatprep.subr.bf16.mxu0 %v6337_v50  ;;  %v6406_v49 = vld [vmem:[#allocation5 + $0x74c] ss:$48 sps:$4 sm:$0xff]   ;;  %v7268_v50 = vsub.s32 1, %v7253_v18 }
 0x158   : > { %v7250_v57 = vpop.f32.mrf.mxu1  ;;  %2513 = vmatprep.subr.bf16.mxu1 %v6340_v51  ;;  %2543 = vmatprep.mubr.bf16.mxu1 %v7224_v52  ;;  %v6356_v52 = vld [vmem:[#allocation5 + $0x148] ss:$48 sps:$4 sm:$0xff]  }
 0x159   : > { %v6404_v51 = vld [vmem:[#allocation5 + $0x748] ss:$48 sps:$4 sm:$0xff]  }
 0x15a   : > { %v2180_v59 = vpop.f32.mrf.mxu1  ;;  %2448 = vmatpush2.bf16.msra.mxu0 %v6335_v54  ;;  %v6412_v54 = vld [vmem:[#allocation5 + $0x6ec] ss:$48 sps:$4 sm:$0xff]  }
 0x15b   : > { %2514 = vmatpush1.bf16.msra.mxu1 %v6338_v55  ;;  %2449 = vmatprep.subr.bf16.mxu0 %v6343_v56  ;;  %v597_v55 = vrot.slane %v7255_v23, %v7268_v50  ;;  %v6407_v56 = vld [vmem:[#allocation5 + $0x3e8] ss:$48 sps:$4 sm:$0xff]   ;;  %v6415_v59 = vld [vmem:[#allocation5 + $0x38c] ss:$48 sps:$4 sm:$0xff]  }
 0x15c   : > { %v2181_v63 = vpop.f32.mrf.mxu1  ;;  %2515 = vmatprep.subr.bf16.mxu1 %v6346_v58  ;;  %v6410_v58 = vld [vmem:[#allocation5 + $0x6e8] ss:$48 sps:$4 sm:$0xff]  }
 0x15d   : > { %v6416_v63 = vld [vmem:[#allocation5 + $0x688] ss:$48 sps:$4 sm:$0xff]  }
 0x15e   : > { %2450 = vmatpush2.bf16.msra.mxu0 %v6341_v60  ;;  %v6418_v60 = vld [vmem:[#allocation5 + $0x68c] ss:$48 sps:$4 sm:$0xff]  }
 0x15f   : > { %2516 = vmatpush1.bf16.msra.mxu1 %v6344_v61  ;;  %2451 = vmatprep.subr.bf16.mxu0 %v6349_v62  ;;  %v6413_v62 = vld [vmem:[#allocation5 + $0x388] ss:$48 sps:$4 sm:$0xff]  }
 0x160   : > { %2517 = vmatprep.subr.bf16.mxu1 %v6352_v1  ;;  %v6421_v1 = vld [vmem:[#allocation5 + $0x32c] ss:$48 sps:$4 sm:$0xff]  }
 0x162   : > { %2452 = vmatpush2.bf16.msra.mxu0 %v6347_v2  ;;  %v6424_v2 = vld [vmem:[#allocation5 + $0x62c] ss:$48 sps:$4 sm:$0xff]  }
 0x163   : > { %2518 = vmatpush1.bf16.msra.mxu1 %v6350_v3  ;;  %2453 = vmatprep.subr.bf16.mxu0 %v6355_v4  ;;  %v6419_v4 = vld [vmem:[#allocation5 + $0x328] ss:$48 sps:$4 sm:$0xff]  }
 0x164   : > { %2519 = vmatprep.subr.bf16.mxu1 %v6358_v5  ;;  %v6422_v5 = vld [vmem:[#allocation5 + $0x628] ss:$48 sps:$4 sm:$0xff]  }
 0x166   : > { %2454 = vmatpush2.bf16.msra.mxu0 %v6353_v6  ;;  %v6427_v6 = vld [vmem:[#allocation8 + $0xac] ss:$12 sps:$4 sm:$0xff]  }
 0x167   : > { %2520 = vmatpush1.bf16.msra.mxu1 %v6356_v52  ;;  %2455 = vmatprep.subr.bf16.mxu0 %v6361_v8  ;;  %v6430_v52 = vld [vmem:[#allocation8 + $0x22c] ss:$12 sps:$4 sm:$0xff]  }
 0x168   : > { %2521 = vmatprep.subr.bf16.mxu1 %v6364_v9  ;;  %v6425_v9 = vld [vmem:[#allocation8 + $0xa8] ss:$12 sps:$4 sm:$0xff]  }
 0x16a   : > { %2456 = vmatpush2.bf16.msra.mxu0 %v6359_v10  ;;  %v604_v10 = vsub.s32 3, %v7253_v18 }
 0x16b   : > { %2522 = vmatpush1.bf16.msra.mxu1 %v6362_v11  ;;  %2457 = vmatprep.subr.bf16.mxu0 %v6367_v12  ;;  %v6428_v11 = vld [vmem:[#allocation8 + $0x228] ss:$12 sps:$4 sm:$0xff]  }
 0x16c   : > { %2523 = vmatprep.subr.bf16.mxu1 %v6370_v14  ;;  %v6433_v12 = vld [vmem:[#allocation8 + $0x94] ss:$12 sps:$4 sm:$0xff]   ;;  %v6431_v14 = vld [vmem:[#allocation8 + $0x90] ss:$12 sps:$4 sm:$0xff]  }
 0x16e   : > { %2458 = vmatpush2.bf16.msra.mxu0 %v6365_v15  ;;  %v6436_v15 = vld [vmem:[#allocation8 + $0x214] ss:$12 sps:$4 sm:$0xff]  }
 0x16f   : > { %2524 = vmatpush1.bf16.msra.mxu1 %v6368_v16  ;;  %2459 = vmatprep.subr.bf16.mxu0 %v6373_v17 }
 0x170   : > { %2525 = vmatprep.subr.bf16.mxu1 %v6376_v20  ;;  %v6434_v20 = vld [vmem:[#allocation8 + $0x210] ss:$12 sps:$4 sm:$0xff]  }
 0x172   : > { %2460 = vmatpush2.bf16.msra.mxu0 %v6371_v21  ;;  %v6439_v21 = vld [vmem:[#allocation8 + $0x7c] ss:$12 sps:$4 sm:$0xff]  }
 0x173   : > { %2526 = vmatpush1.bf16.msra.mxu1 %v6374_v22  ;;  %2552 = vmatprep.subr.bf16.mxu0 %v6382_v25 }
 0x174   : > { %2527 = vmatprep.subr.bf16.mxu1 %v6379_v35 }
 0x175   : > { %v2135_v32 = vpop.f32.mrf.mxu0  ;;  %2462 = vmatmul.mubr.bf16.vlgmr.msra.gmra.mxu0 %v7228_v7 }
 0x176   : > { %v2136_v37 = vadd.f32 %v2135_v32, %v593_v28  ;;  %2553 = vmatpush1.bf16.msra.mxu0 %v6380_v27  ;;  %2584 = vmatprep.mubr.bf16.mxu0 %v7026_v0  ;;  %v6401_v0 = vld [vmem:[#allocation5 + $0x448] ss:$48 sps:$4 sm:$0xff]   ;;  %v6445_v32 = vld [vmem:[#allocation8 + $0x64] ss:$12 sps:$4 sm:$0xff]  }
 0x177   : > { %2528 = vmatpush2.bf16.msra.mxu1 %v6377_v26  ;;  %v2137_v38 = vpop.f32.mrf.mxu0  ;;  %2554 = vmatprep.subr.bf16.mxu0 %v6388_v30  ;;  %v6437_v26 = vld [vmem:[#allocation8 + $0x78] ss:$12 sps:$4 sm:$0xff]   ;;  %v6442_v27 = vld [vmem:[#allocation8 + $0x1fc] ss:$12 sps:$4 sm:$0xff]  }
 0x178   : > { %2529 = vmatprep.subr.bf16.mxu1 %v6385_v29  ;;  %v7264_v39 = vadd.f32 %v7247_v53, %v2136_v37  ;;  %v6409_v53 = vld [vmem:[#allocation5 + $0x3ec] ss:$48 sps:$4 sm:$0xff]   ;;  %v2138_v61 = vadd.f32 %v2137_v38, %v597_v55  ;;  %v6440_v30 = vld [vmem:[#allocation8 + $0x1f8] ss:$12 sps:$4 sm:$0xff]  }
 0x179   : > { %v2139_v42 = vpop.f32.mrf.mxu0  ;;  %v6443_v37 = vld [vmem:[#allocation8 + $0x60] ss:$12 sps:$4 sm:$0xff]   ;;  %v6472_v55 = vld [vmem:[#allocation8 + $0x184] ss:$12 sps:$4 sm:$0xff]  }
 0x17a   : > { %2555 = vmatpush1.bf16.msra.mxu0 %v6386_v33  ;;  %v2179_v3 = vadd.f32 %v7250_v57, %v2138_v61  ;;  %v605_v57 = vrot.slane %v7255_v23, %v604_v10  ;;  %v6448_v33 = vld [vmem:[#allocation8 + $0x1e4] ss:$12 sps:$4 sm:$0xff]   ;;  %v6446_v38 = vld [vmem:[#allocation8 + $0x1e0] ss:$12 sps:$4 sm:$0xff]   ;;  %v6449_v42 = vld [vmem:[#allocation8 + $0x48] ss:$12 sps:$4 sm:$0xff]  }
 0x17b   : > { %2530 = vmatpush2.bf16.msra.mxu1 %v6383_v31  ;;  %v2140_v45 = vpop.f32.mrf.mxu0  ;;  %2556 = vmatprep.subr.bf16.mxu0 %v6394_v36  ;;  %v6473_v61 = vld [vmem:[#allocation8 + $0x168] ss:$12 sps:$4 sm:$0xff]  }
 0x17c   : > { %2531 = vmatprep.subr.bf16.mxu1 %v6391_v34  ;;  %v2594_v8 = vmax.f32 %v2179_v3, 0.0  ;;  %v6460_v45 = vld [vmem:[#allocation8 + $0x1b4] ss:$12 sps:$4 sm:$0xff]  }
 0x17e   : > { %2557 = vmatpush1.bf16.msra.mxu0 %v6392_v41  ;;  %v7274_v13 = vpack.c.bf16 %v2594_v8, %v2594_v8  ;;  %v6454_v41 = vld [vmem:[#allocation8 + $0x1cc] ss:$12 sps:$4 sm:$0xff]   ;;  %v6490_v8 = vld [vmem:[#allocation8 + $0x2bc] ss:$12 sps:$4 sm:$0xff]  }
 0x17f   : > { %2532 = vmatpush2.bf16.msra.mxu1 %v6389_v40  ;;  %2558 = vmatprep.subr.bf16.mxu0 %v6400_v44  ;;  %v6451_v40 = vld [vmem:[#allocation8 + $0x4c] ss:$12 sps:$4 sm:$0xff]   ;;  %v6457_v44 = vld [vmem:[#allocation8 + $0x34] ss:$12 sps:$4 sm:$0xff]  }
 0x180   : > { %2533 = vmatprep.subr.bf16.mxu1 %v6397_v43  ;;  %v6452_v43 = vld [vmem:[#allocation8 + $0x1c8] ss:$12 sps:$4 sm:$0xff]  }
 0x182   : > { %2559 = vmatpush1.bf16.msra.mxu0 %v6398_v47  ;;  %v6455_v47 = vld [vmem:[#allocation8 + $0x30] ss:$12 sps:$4 sm:$0xff]  }
 0x183   : > { %2534 = vmatpush2.bf16.msra.mxu1 %v6395_v46  ;;  %2560 = vmatprep.subr.bf16.mxu0 %v6406_v49  ;;  %v7290_v46 = vsub.s32 2, %v7253_v18  ;;  %v6463_v49 = vld [vmem:[#allocation8 + $0x1c] ss:$12 sps:$4 sm:$0xff]  }
 0x184   : > { %2535 = vmatprep.subr.bf16.mxu1 %v6403_v48  ;;  %v6458_v48 = vld [vmem:[#allocation8 + $0x1b0] ss:$12 sps:$4 sm:$0xff]  }
 0x186   : > { %2561 = vmatpush1.bf16.msra.mxu0 %v6404_v51  ;;  %v6461_v51 = vld [vmem:[#allocation8 + $0x18] ss:$12 sps:$4 sm:$0xff]  }
 0x187   : > { %2536 = vmatpush2.bf16.msra.mxu1 %v6401_v0  ;;  %2562 = vmatprep.subr.bf16.mxu0 %v6412_v54  ;;  %v6466_v0 = vld [vmem:[#allocation8 + $0x19c] ss:$12 sps:$4 sm:$0xff]   ;;  %v6469_v54 = vld [vmem:[#allocation8 + $0x4] ss:$12 sps:$4 sm:$0xff]  }
 0x188   : > { %2537 = vmatprep.subr.bf16.mxu1 %v6409_v53  ;;  %v6464_v53 = vld [vmem:[#allocation8 + $0x198] ss:$12 sps:$4 sm:$0xff]  }
 0x18a   : > { %2563 = vmatpush1.bf16.msra.mxu0 %v6410_v58  ;;  %v6470_v58 = vld [vmem:[#allocation8 + $0x180] ss:$12 sps:$4 sm:$0xff]  }
 0x18b   : > { %2538 = vmatpush2.bf16.msra.mxu1 %v6407_v56  ;;  %2564 = vmatprep.subr.bf16.mxu0 %v6418_v60  ;;  %v6467_v56 = vld [vmem:[#allocation8] ss:$12 sps:$4 sm:$0xff]  }
 0x18c   : > { %2539 = vmatprep.subr.bf16.mxu1 %v6415_v59  ;;  %v6475_v59 = vld [vmem:[#allocation8 + $0x16c] ss:$12 sps:$4 sm:$0xff]  }
 0x18d   : > { %v6478_v60 = vld [vmem:[#allocation8 + $0x2ec] ss:$12 sps:$4 sm:$0xff]  }
 0x18e   : > { %2565 = vmatpush1.bf16.msra.mxu0 %v6416_v63  ;;  %v6481_v63 = vld [vmem:[#allocation8 + $0x154] ss:$12 sps:$4 sm:$0xff]  }
 0x18f   : > { %2540 = vmatpush2.bf16.msra.mxu1 %v6413_v62  ;;  %2566 = vmatprep.subr.bf16.mxu0 %v6424_v2  ;;  %v6476_v62 = vld [vmem:[#allocation8 + $0x2e8] ss:$12 sps:$4 sm:$0xff]  }
 0x190   : > { %2541 = vmatprep.subr.bf16.mxu1 %v6421_v1  ;;  %v6479_v1 = vld [vmem:[#allocation8 + $0x150] ss:$12 sps:$4 sm:$0xff]   ;;  %v6484_v2 = vld [vmem:[#allocation8 + $0x2d4] ss:$12 sps:$4 sm:$0xff]  }
 0x192   : > { %2567 = vmatpush1.bf16.msra.mxu0 %v6422_v5 }
 0x193   : > { %2542 = vmatpush2.bf16.msra.mxu1 %v6419_v4  ;;  %4554 = vmatprep.subr.bf16.mxu0 %v6427_v6  ;;  %v6482_v4 = vld [vmem:[#allocation8 + $0x2d0] ss:$12 sps:$4 sm:$0xff]  }
 0x194   : > { %4595 = vmatprep.subr.bf16.mxu1 %v6430_v52  ;;  %v6487_v6 = vld [vmem:[#allocation8 + $0x13c] ss:$12 sps:$4 sm:$0xff]   ;;  %v6485_v52 = vld [vmem:[#allocation8 + $0x138] ss:$12 sps:$4 sm:$0xff]  }
 0x195   : > { %v7281_v17 = vpop.f32.mrf.mxu0  ;;  %2585 = vmatmul.mubr.bf16.vlgmr.msra.gmra.mxu0 %v7242_v19 }
 0x196   : > { %v7279_v16 = vpop.f32.mrf.mxu1  ;;  %2544 = vmatmul.mubr.bf16.vlgmr.msra.gmra.mxu1 %v7228_v7  ;;  %4555 = vmatpush1.bf16.msra.mxu0 %v6425_v9 }
 0x197   : > { %4586 = vmatprep.mubr.bf16.mxu0 %v7274_v13  ;;  %4596 = vmatpush1.bf16.msra.mxu1 %v6428_v11  ;;  %v2260_v35 = vpop.f32.mrf.mxu0  ;;  %v6488_v11 = vld [vmem:[#allocation8 + $0x2b8] ss:$12 sps:$4 sm:$0xff]  }
 0x198   : > { %v2219_v22 = vpop.f32.mrf.mxu1  ;;  %4556 = vmatprep.subr.bf16.mxu0 %v6433_v12  ;;  %4597 = vmatprep.subr.bf16.mxu1 %v6436_v15  ;;  %v6496_v15 = vld [vmem:[#allocation8 + $0x2a4] ss:$12 sps:$4 sm:$0xff]  }
 0x199   : > { %v2220_v25 = vadd.f32 %v2219_v22, %v605_v57  ;;  %v2262_v29 = vpop.f32.mrf.mxu0  ;;  %v6493_v57 = vld [vmem:[#allocation8 + $0x124] ss:$12 sps:$4 sm:$0xff]   ;;  %v6497_v22 = vld [vmem:[#allocation8 + $0x108] ss:$12 sps:$4 sm:$0xff]  }
 0x19a   : > { %v2221_v28 = vpop.f32.mrf.mxu1  ;;  %4557 = vmatpush1.bf16.msra.mxu0 %v6431_v14  ;;  %v6491_v14 = vld [vmem:[#allocation8 + $0x120] ss:$12 sps:$4 sm:$0xff]  }
 0x19b   : > { %v2261_v31 = vadd.f32 %v2260_v35, %v2220_v25  ;;  %4598 = vmatpush1.bf16.msra.mxu1 %v6434_v20  ;;  %v2263_v19 = vpop.f32.mrf.mxu0  ;;  %4558 = vmatprep.subr.bf16.mxu0 %v6439_v21  ;;  %v6494_v20 = vld [vmem:[#allocation8 + $0x2a0] ss:$12 sps:$4 sm:$0xff]   ;;  %v6500_v25 = vld [vmem:[#allocation8 + $0x288] ss:$12 sps:$4 sm:$0xff]   ;;  %v601_v28 = vrot.slane %v7255_v23, %v7290_v46 }
 0x19c   : > { %v2222_v7 = vpop.f32.mrf.mxu1  ;;  %4599 = vmatprep.subr.bf16.mxu1 %v6442_v27  ;;  %v6499_v21 = vld [vmem:[#allocation8 + $0x10c] ss:$12 sps:$4 sm:$0xff]   ;;  %v612_v27 = vsub.s32 5, %v7253_v18  ;;  %v6508_v29 = vld [vmem:[#allocation8 + $0x274] ss:$12 sps:$4 sm:$0xff]  }
 0x19d   : > { %v2596_v34 = vmax.f32 %v2261_v31, 0.0  ;;  %v6502_v35 = vld [vmem:[#allocation8 + $0x28c] ss:$12 sps:$4 sm:$0xff]   ;;  %v6506_v31 = vld [vmem:[#allocation8 + $0x270] ss:$12 sps:$4 sm:$0xff]   ;;  %v2218_v19 = vadd.f32 %v7279_v16, %v601_v28  ;;  %v2593_v16 = vmax.f32 %v7264_v39, 0.0 }
 0x19e   : > { %4559 = vmatpush1.bf16.msra.mxu0 %v6437_v26  ;;  %v6505_v26 = vld [vmem:[#allocation8 + $0xf4] ss:$12 sps:$4 sm:$0xff]   ;;  %v6511_v7 = vld [vmem:[#allocation8 + $0xdc] ss:$12 sps:$4 sm:$0xff]   ;;  %v6568_v28 = vld [vmem:[#allocation8 + $0x484] ss:$12 sps:$4 sm:$0xff]  }
 0x19f   : > { %v7286_v36 = vpack.c.bf16 %v2596_v34, %v2596_v34  ;;  %4600 = vmatpush1.bf16.msra.mxu1 %v6440_v30  ;;  %4560 = vmatprep.subr.bf16.mxu0 %v6445_v32  ;;  %v6503_v30 = vld [vmem:[#allocation8 + $0xf0] ss:$12 sps:$4 sm:$0xff]   ;;  %v6512_v34 = vld [vmem:[#allocation8 + $0x258] ss:$12 sps:$4 sm:$0xff]  }
 0x1a0   : > { %4601 = vmatprep.subr.bf16.mxu1 %v6448_v33  ;;  %v6514_v32 = vld [vmem:[#allocation8 + $0x25c] ss:$12 sps:$4 sm:$0xff]   ;;  %v6509_v33 = vld [vmem:[#allocation8 + $0xd8] ss:$12 sps:$4 sm:$0xff]  }
 0x1a1   : > { %4627 = vmatprep.mubr.bf16.mxu1 %v7286_v36 }
 0x1a2   : > { %4561 = vmatpush1.bf16.msra.mxu0 %v6443_v37  ;;  %v6517_v37 = vld [vmem:[#allocation8 + $0xc4] ss:$12 sps:$4 sm:$0xff]  }
 0x1a3   : > { %4602 = vmatpush1.bf16.msra.mxu1 %v6446_v38  ;;  %4562 = vmatprep.subr.bf16.mxu0 %v6451_v40  ;;  %v2259_v38 = vadd.f32 %v7281_v17, %v2218_v19  ;;  %v6520_v40 = vld [vmem:[#allocation8 + $0x244] ss:$12 sps:$4 sm:$0xff]   ;;  %v7302_v17 = vpack.c.bf16 %v2593_v16, %v2593_v16  ;;  %v620_v19 = vsub.s32 7, %v7253_v18 }
 0x1a4   : > { %4603 = vmatprep.subr.bf16.mxu1 %v6454_v41  ;;  %v6515_v41 = vld [vmem:[#allocation8 + $0xc0] ss:$12 sps:$4 sm:$0xff]  }
 0x1a6   : > { %4563 = vmatpush1.bf16.msra.mxu0 %v6449_v42  ;;  %v6518_v42 = vld [vmem:[#allocation8 + $0x240] ss:$12 sps:$4 sm:$0xff]  }
 0x1a7   : > { %4604 = vmatpush1.bf16.msra.mxu1 %v6452_v43  ;;  %4564 = vmatprep.subr.bf16.mxu0 %v6457_v44  ;;  %v6523_v43 = vld [vmem:[#allocation8 + $0x3ac] ss:$12 sps:$4 sm:$0xff]  }
 0x1a8   : > { %4605 = vmatprep.subr.bf16.mxu1 %v6460_v45  ;;  %v6526_v44 = vld [vmem:[#allocation8 + $0x52c] ss:$12 sps:$4 sm:$0xff]   ;;  %v2595_v45 = vmax.f32 %v2259_v38, 0.0 }
 0x1aa   : > { %4565 = vmatpush1.bf16.msra.mxu0 %v6455_v47  ;;  %v6521_v47 = vld [vmem:[#allocation8 + $0x3a8] ss:$12 sps:$4 sm:$0xff]  }
 0x1ab   : > { %4606 = vmatpush1.bf16.msra.mxu1 %v6458_v48  ;;  %4566 = vmatprep.subr.bf16.mxu0 %v6463_v49  ;;  %v6524_v48 = vld [vmem:[#allocation8 + $0x528] ss:$12 sps:$4 sm:$0xff]  }
 0x1ac   : > { %4607 = vmatprep.subr.bf16.mxu1 %v6466_v0  ;;  %v6529_v49 = vld [vmem:[#allocation8 + $0x394] ss:$12 sps:$4 sm:$0xff]   ;;  %v7304_v0 = vpack.c.bf16 %v2595_v45, %v2595_v45  ;;  %v6578_v45 = vld [vmem:[#allocation8 + $0x5d0] ss:$12 sps:$4 sm:$0xff]  }
 0x1ae   : > { %4567 = vmatpush1.bf16.msra.mxu0 %v6461_v51  ;;  %v613_v51 = vrot.slane %v7255_v23, %v612_v27  ;;  %v6565_v27 = vld [vmem:[#allocation8 + $0x304] ss:$12 sps:$4 sm:$0xff]  }
 0x1af   : > { %4608 = vmatpush1.bf16.msra.mxu1 %v6464_v53  ;;  %4568 = vmatprep.subr.bf16.mxu0 %v6469_v54  ;;  %v6527_v53 = vld [vmem:[#allocation8 + $0x390] ss:$12 sps:$4 sm:$0xff]   ;;  %v6532_v54 = vld [vmem:[#allocation8 + $0x514] ss:$12 sps:$4 sm:$0xff]  }
 0x1b0   : > { %4609 = vmatprep.subr.bf16.mxu1 %v6472_v55  ;;  %v6530_v55 = vld [vmem:[#allocation8 + $0x510] ss:$12 sps:$4 sm:$0xff]  }
 0x1b2   : > { %4569 = vmatpush1.bf16.msra.mxu0 %v6467_v56 }
 0x1b3   : > { %4610 = vmatpush1.bf16.msra.mxu1 %v6470_v58  ;;  %4570 = vmatprep.subr.bf16.mxu0 %v6475_v59  ;;  %v6535_v58 = vld [vmem:[#allocation8 + $0x37c] ss:$12 sps:$4 sm:$0xff]  }
 0x1b4   : > { %4611 = vmatprep.subr.bf16.mxu1 %v6478_v60  ;;  %v6538_v60 = vld [vmem:[#allocation8 + $0x4fc] ss:$12 sps:$4 sm:$0xff]  }
 0x1b6   : > { %v7292_v3 = vpop.f32.mrf.mxu1  ;;  %4571 = vmatpush2.bf16.msra.mxu0 %v6473_v61 }
 0x1b7   : > { %4612 = vmatpush2.bf16.msra.mxu1 %v6476_v62  ;;  %4572 = vmatprep.subr.bf16.mxu0 %v6481_v63  ;;  %v6533_v62 = vld [vmem:[#allocation8 + $0x378] ss:$12 sps:$4 sm:$0xff]  }
 0x1b8   : > { %v7294_v5 = vpop.f32.mrf.mxu1  ;;  %4613 = vmatprep.subr.bf16.mxu1 %v6484_v2  ;;  %v6536_v63 = vld [vmem:[#allocation8 + $0x4f8] ss:$12 sps:$4 sm:$0xff]  }
 0x1b9   : > { %v6541_v2 = vld [vmem:[#allocation8 + $0x364] ss:$12 sps:$4 sm:$0xff]  }
 0x1ba   : > { %v2344_v9 = vpop.f32.mrf.mxu1  ;;  %4573 = vmatpush2.bf16.msra.mxu0 %v6479_v1 }
 0x1bb   : > { %4614 = vmatpush2.bf16.msra.mxu1 %v6482_v4  ;;  %4574 = vmatprep.subr.bf16.mxu0 %v6487_v6  ;;  %v6539_v6 = vld [vmem:[#allocation8 + $0x360] ss:$12 sps:$4 sm:$0xff]  }
 0x1bc   : > { %v2345_v12 = vpop.f32.mrf.mxu1  ;;  %4615 = vmatprep.subr.bf16.mxu1 %v6490_v8  ;;  %v6542_v8 = vld [vmem:[#allocation8 + $0x4e0] ss:$12 sps:$4 sm:$0xff]  }
 0x1bd   : > { %v6545_v12 = vld [vmem:[#allocation8 + $0x348] ss:$12 sps:$4 sm:$0xff]  }
 0x1be   : > { %4575 = vmatpush2.bf16.msra.mxu0 %v6485_v52  ;;  %v6544_v52 = vld [vmem:[#allocation8 + $0x4e4] ss:$12 sps:$4 sm:$0xff]  }
 0x1bf   : > { %4616 = vmatpush2.bf16.msra.mxu1 %v6488_v11  ;;  %4576 = vmatprep.subr.bf16.mxu0 %v6493_v57  ;;  %v6547_v11 = vld [vmem:[#allocation8 + $0x34c] ss:$12 sps:$4 sm:$0xff]   ;;  %v6548_v57 = vld [vmem:[#allocation8 + $0x4c8] ss:$12 sps:$4 sm:$0xff]  }
 0x1c0   : > { %4617 = vmatprep.subr.bf16.mxu1 %v6496_v15  ;;  %v6556_v15 = vld [vmem:[#allocation8 + $0x4b4] ss:$12 sps:$4 sm:$0xff]  }
 0x1c2   : > { %4577 = vmatpush2.bf16.msra.mxu0 %v6491_v14  ;;  %v6553_v14 = vld [vmem:[#allocation8 + $0x334] ss:$12 sps:$4 sm:$0xff]  }
 0x1c3   : > { %4618 = vmatpush2.bf16.msra.mxu1 %v6494_v20  ;;  %4578 = vmatprep.subr.bf16.mxu0 %v6499_v21  ;;  %v6551_v20 = vld [vmem:[#allocation8 + $0x330] ss:$12 sps:$4 sm:$0xff]  }
 0x1c4   : > { %4619 = vmatprep.subr.bf16.mxu1 %v6502_v35  ;;  %v6554_v21 = vld [vmem:[#allocation8 + $0x4b0] ss:$12 sps:$4 sm:$0xff]  }
 0x1c5   : > { %v6562_v35 = vld [vmem:[#allocation8 + $0x49c] ss:$12 sps:$4 sm:$0xff]  }
 0x1c6   : > { %4579 = vmatpush2.bf16.msra.mxu0 %v6497_v22  ;;  %v6559_v22 = vld [vmem:[#allocation8 + $0x31c] ss:$12 sps:$4 sm:$0xff]  }
 0x1c7   : > { %4620 = vmatpush2.bf16.msra.mxu1 %v6500_v25  ;;  %4580 = vmatprep.subr.bf16.mxu0 %v6505_v26  ;;  %v6557_v25 = vld [vmem:[#allocation8 + $0x318] ss:$12 sps:$4 sm:$0xff]  }
 0x1c8   : > { %4621 = vmatprep.subr.bf16.mxu1 %v6508_v29  ;;  %v6560_v26 = vld [vmem:[#allocation8 + $0x498] ss:$12 sps:$4 sm:$0xff]   ;;  %v6563_v29 = vld [vmem:[#allocation8 + $0x300] ss:$12 sps:$4 sm:$0xff]  }
 0x1ca   : > { %4581 = vmatpush2.bf16.msra.mxu0 %v6503_v30  ;;  %v6566_v30 = vld [vmem:[#allocation8 + $0x480] ss:$12 sps:$4 sm:$0xff]  }
 0x1cb   : > { %4622 = vmatpush2.bf16.msra.mxu1 %v6506_v31  ;;  %4582 = vmatprep.subr.bf16.mxu0 %v6511_v7  ;;  %v6571_v31 = vld [vmem:[#allocation8 + $0x46c] ss:$12 sps:$4 sm:$0xff]  }
 0x1cc   : > { %4623 = vmatprep.subr.bf16.mxu1 %v6514_v32  ;;  %v6574_v7 = vld [vmem:[#allocation8 + $0x5ec] ss:$12 sps:$4 sm:$0xff]   ;;  %v6569_v32 = vld [vmem:[#allocation8 + $0x468] ss:$12 sps:$4 sm:$0xff]  }
 0x1ce   : > { %4583 = vmatpush2.bf16.msra.mxu0 %v6509_v33  ;;  %v6572_v33 = vld [vmem:[#allocation8 + $0x5e8] ss:$12 sps:$4 sm:$0xff]  }
 0x1cf   : > { %4624 = vmatpush2.bf16.msra.mxu1 %v6512_v34  ;;  %4584 = vmatprep.subr.bf16.mxu0 %v6517_v37  ;;  %v6577_v34 = vld [vmem:[#allocation8 + $0x454] ss:$12 sps:$4 sm:$0xff]  }
 0x1d0   : > { %4625 = vmatprep.subr.bf16.mxu1 %v6520_v40  ;;  %v6810_v37 = vld [vmem:[#allocation7] sm:$0xff] }
 0x1d1   : > { %v621_v38 = vrot.slane %v6810_v37, %v620_v19  ;;  %v6580_v40 = vld [vmem:[#allocation8 + $0x5d4] ss:$12 sps:$4 sm:$0xff]  }
 0x1d2   : > { %4585 = vmatpush2.bf16.msra.mxu0 %v6515_v41  ;;  %v6614_v19 = vld [vmem:[#allocation8 + $0x540] ss:$12 sps:$4 sm:$0xff]  }
 0x1d3   : > { %4626 = vmatpush2.bf16.msra.mxu1 %v6518_v42  ;;  %4636 = vmatprep.subr.bf16.mxu0 %v6523_v43  ;;  %v6575_v43 = vld [vmem:[#allocation8 + $0x450] ss:$12 sps:$4 sm:$0xff]  }
 0x1d4   : > { %4677 = vmatprep.subr.bf16.mxu1 %v6526_v44 }
 0x1d5   : > { %v7307_v39 = vpop.f32.mrf.mxu0  ;;  %4587 = vmatmul.mubr.bf16.vlgmr.msra.gmra.mxu0 %v7302_v17 }
 0x1d6   : > { %4628 = vmatmul.mubr.bf16.vlgmr.msra.gmra.mxu1 %v7304_v0  ;;  %4637 = vmatpush1.bf16.msra.mxu0 %v6521_v47  ;;  %v6583_v47 = vld [vmem:[#allocation8 + $0x43c] ss:$12 sps:$4 sm:$0xff]  }
 0x1d7   : > { %4678 = vmatpush1.bf16.msra.mxu1 %v6524_v48  ;;  %v2301_v56 = vpop.f32.mrf.mxu0  ;;  %4638 = vmatprep.subr.bf16.mxu0 %v6529_v49  ;;  %v6586_v49 = vld [vmem:[#allocation8 + $0x5bc] ss:$12 sps:$4 sm:$0xff]  }
 0x1d8   : > { %v2302_v59 = vadd.f32 %v2301_v56, %v613_v51  ;;  %4679 = vmatprep.subr.bf16.mxu1 %v6532_v54  ;;  %v6584_v56 = vld [vmem:[#allocation8 + $0x5b8] ss:$12 sps:$4 sm:$0xff]  }
 0x1d9   : > { %v2303_v61 = vpop.f32.mrf.mxu0 }
 0x1da   : > { %v2343_v23 = vadd.f32 %v7294_v5, %v2302_v59  ;;  %4639 = vmatpush1.bf16.msra.mxu0 %v6527_v53  ;;  %v6550_v5 = vld [vmem:[#allocation8 + $0x4cc] ss:$12 sps:$4 sm:$0xff]   ;;  %v608_v61 = vsub.s32 4, %v7253_v18 }
 0x1db   : > { %4680 = vmatpush1.bf16.msra.mxu1 %v6530_v55  ;;  %v2304_v1 = vpop.f32.mrf.mxu0  ;;  %4640 = vmatprep.subr.bf16.mxu0 %v6535_v58  ;;  %v6581_v55 = vld [vmem:[#allocation8 + $0x438] ss:$12 sps:$4 sm:$0xff]  }
 0x1dc   : > { %v2598_v4 = vmax.f32 %v2343_v23, 0.0  ;;  %4681 = vmatprep.subr.bf16.mxu1 %v6538_v60  ;;  %v6589_v60 = vld [vmem:[#allocation8 + $0x424] ss:$12 sps:$4 sm:$0xff]   ;;  %v6587_v23 = vld [vmem:[#allocation8 + $0x420] ss:$12 sps:$4 sm:$0xff]  }
 0x1dd   : > { %v6590_v1 = vld [vmem:[#allocation8 + $0x5a0] ss:$12 sps:$4 sm:$0xff]  }
 0x1de   : > { %v7312_v9 = vpack.c.bf16 %v2598_v4, %v2598_v4  ;;  %4641 = vmatpush1.bf16.msra.mxu0 %v6533_v62  ;;  %v6595_v4 = vld [vmem:[#allocation8 + $0x40c] ss:$12 sps:$4 sm:$0xff]  }
 0x1df   : > { %4682 = vmatpush1.bf16.msra.mxu1 %v6536_v63  ;;  %4642 = vmatprep.subr.bf16.mxu0 %v6541_v2  ;;  %v6592_v63 = vld [vmem:[#allocation8 + $0x5a4] ss:$12 sps:$4 sm:$0xff]  }
 0x1e0   : > { %4668 = vmatprep.mubr.bf16.mxu0 %v7312_v9  ;;  %4683 = vmatprep.subr.bf16.mxu1 %v6544_v52  ;;  %v6598_v52 = vld [vmem:[#allocation8 + $0x58c] ss:$12 sps:$4 sm:$0xff]  }
 0x1e2   : > { %4643 = vmatpush1.bf16.msra.mxu0 %v6539_v6  ;;  %v616_v6 = vsub.s32 6, %v7253_v18 }
 0x1e3   : > { %4684 = vmatpush1.bf16.msra.mxu1 %v6542_v8  ;;  %4644 = vmatprep.subr.bf16.mxu0 %v6547_v11  ;;  %v6593_v8 = vld [vmem:[#allocation8 + $0x408] ss:$12 sps:$4 sm:$0xff]   ;;  %v609_v11 = vrot.slane %v6810_v37, %v608_v61  ;;  %v6652_v61 = vld [vmem:[#allocation8 + $0x7cc] ss:$12 sps:$4 sm:$0xff]  }
 0x1e4   : > { %4685 = vmatprep.subr.bf16.mxu1 %v6550_v5  ;;  %v6596_v5 = vld [vmem:[#allocation8 + $0x588] ss:$12 sps:$4 sm:$0xff]  }
 0x1e6   : > { %4645 = vmatpush1.bf16.msra.mxu0 %v6545_v12  ;;  %v6601_v12 = vld [vmem:[#allocation8 + $0x3f4] ss:$12 sps:$4 sm:$0xff]  }
 0x1e7   : > { %4686 = vmatpush1.bf16.msra.mxu1 %v6548_v57  ;;  %4646 = vmatprep.subr.bf16.mxu0 %v6553_v14  ;;  %v617_v57 = vrot.slane %v6810_v37, %v616_v6  ;;  %v6604_v14 = vld [vmem:[#allocation8 + $0x574] ss:$12 sps:$4 sm:$0xff]   ;;  %v6649_v6 = vld [vmem:[#allocation8 + $0x61c] ss:$12 sps:$4 sm:$0xff]  }
 0x1e8   : > { %4687 = vmatprep.subr.bf16.mxu1 %v6556_v15  ;;  %v6599_v15 = vld [vmem:[#allocation8 + $0x3f0] ss:$12 sps:$4 sm:$0xff]  }
 0x1ea   : > { %4647 = vmatpush1.bf16.msra.mxu0 %v6551_v20  ;;  %v2300_v20 = vadd.f32 %v7307_v39, %v609_v11  ;;  %v6611_v39 = vld [vmem:[#allocation8 + $0x3c0] ss:$12 sps:$4 sm:$0xff]   ;;  %v6647_v11 = vld [vmem:[#allocation8 + $0x618] ss:$12 sps:$4 sm:$0xff]  }
 0x1eb   : > { %4688 = vmatpush1.bf16.msra.mxu1 %v6554_v21  ;;  %4648 = vmatprep.subr.bf16.mxu0 %v6559_v22  ;;  %v6602_v21 = vld [vmem:[#allocation8 + $0x570] ss:$12 sps:$4 sm:$0xff]  }
 0x1ec   : > { %4689 = vmatprep.subr.bf16.mxu1 %v6562_v35  ;;  %v6607_v22 = vld [vmem:[#allocation8 + $0x3dc] ss:$12 sps:$4 sm:$0xff]  }
 0x1ee   : > { %4649 = vmatpush1.bf16.msra.mxu0 %v6557_v25  ;;  %v6610_v25 = vld [vmem:[#allocation8 + $0x55c] ss:$12 sps:$4 sm:$0xff]  }
 0x1ef   : > { %4690 = vmatpush1.bf16.msra.mxu1 %v6560_v26  ;;  %4650 = vmatprep.subr.bf16.mxu0 %v6565_v27  ;;  %v6605_v26 = vld [vmem:[#allocation8 + $0x3d8] ss:$12 sps:$4 sm:$0xff]   ;;  %v2341_v27 = vadd.f32 %v7292_v3, %v2300_v20  ;;  %v6617_v3 = vld [vmem:[#allocation8 + $0x6a8] ss:$12 sps:$4 sm:$0xff]   ;;  %v6668_v20 = vld [vmem:[#allocation8 + $0x780] ss:$12 sps:$4 sm:$0xff]  }
 0x1f0   : > { %4691 = vmatprep.subr.bf16.mxu1 %v6568_v28  ;;  %v6608_v28 = vld [vmem:[#allocation8 + $0x558] ss:$12 sps:$4 sm:$0xff]  }
 0x1f2   : > { %4651 = vmatpush1.bf16.msra.mxu0 %v6563_v29  ;;  %v6613_v29 = vld [vmem:[#allocation8 + $0x3c4] ss:$12 sps:$4 sm:$0xff]  }
 0x1f3   : > { %4692 = vmatpush1.bf16.msra.mxu1 %v6566_v30  ;;  %4652 = vmatprep.subr.bf16.mxu0 %v6571_v31  ;;  %v6616_v31 = vld [vmem:[#allocation8 + $0x544] ss:$12 sps:$4 sm:$0xff]  }
 0x1f4   : > { %4693 = vmatprep.subr.bf16.mxu1 %v6574_v7  ;;  %v2597_v7 = vmax.f32 %v2341_v27, 0.0 }
 0x1f5   : > { %v7316_v42 = vpop.f32.mrf.mxu0 }
 0x1f6   : > { %v2381_v41 = vpop.f32.mrf.mxu1  ;;  %4653 = vmatpush2.bf16.msra.mxu0 %v6569_v32  ;;  %v6619_v32 = vld [vmem:[#allocation8 + $0x6ac] ss:$12 sps:$4 sm:$0xff]   ;;  %v7326_v37 = vpack.c.bf16 %v2597_v7, %v2597_v7  ;;  %v6680_v7 = vld [vmem:[#allocation8 + $0x8d0] ss:$12 sps:$4 sm:$0xff]  }
 0x1f7   : > { %4694 = vmatpush2.bf16.msra.mxu1 %v6572_v33  ;;  %v2424_v16 = vpop.f32.mrf.mxu0  ;;  %4654 = vmatprep.subr.bf16.mxu0 %v6577_v34  ;;  %v2382_v35 = vadd.f32 %v2381_v41, %v617_v57  ;;  %v6628_v34 = vld [vmem:[#allocation8 + $0x82c] ss:$12 sps:$4 sm:$0xff]   ;;  %v6670_v57 = vld [vmem:[#allocation8 + $0x784] ss:$12 sps:$4 sm:$0xff]  }
 0x1f8   : > { %v2383_v44 = vpop.f32.mrf.mxu1  ;;  %4695 = vmatprep.subr.bf16.mxu1 %v6580_v40  ;;  %v6626_v40 = vld [vmem:[#allocation8 + $0x828] ss:$12 sps:$4 sm:$0xff]  }
 0x1f9   : > { %v2384_v48 = vadd.f32 %v2383_v44, %v621_v38  ;;  %v2426_v53 = vpop.f32.mrf.mxu0  ;;  %v2423_v30 = vadd.f32 %v7316_v42, %v2382_v35  ;;  %v6622_v38 = vld [vmem:[#allocation8 + $0x694] ss:$12 sps:$4 sm:$0xff]   ;;  %v6620_v44 = vld [vmem:[#allocation8 + $0x690] ss:$12 sps:$4 sm:$0xff]  }
 0x1fa   : > { %v2385_v51 = vpop.f32.mrf.mxu1  ;;  %4655 = vmatpush2.bf16.msra.mxu0 %v6575_v43  ;;  %v6634_v42 = vld [vmem:[#allocation8 + $0x814] ss:$12 sps:$4 sm:$0xff]   ;;  %v7336_v35 = vld [vmem:[#allocation7 + $0x8] sm:$0xf] }
 0x1fb   : > { %v2425_v54 = vadd.f32 %v2424_v16, %v2384_v48  ;;  %4696 = vmatpush2.bf16.msra.mxu1 %v6578_v45  ;;  %v2427_v59 = vpop.f32.mrf.mxu0  ;;  %4656 = vmatprep.subr.bf16.mxu0 %v6583_v47  ;;  %v2599_v33 = vmax.f32 %v2423_v30, 0.0  ;;  %v6625_v45 = vld [vmem:[#allocation8 + $0x67c] ss:$12 sps:$4 sm:$0xff]   ;;  %v6623_v51 = vld [vmem:[#allocation8 + $0x678] ss:$12 sps:$4 sm:$0xff]   ;;  %v629_v27 = vrot.slane %v7336_v35, %v7268_v50 }
 0x1fc   : > { %v2386_v58 = vpop.f32.mrf.mxu1  ;;  %4697 = vmatprep.subr.bf16.mxu1 %v6586_v49  ;;  %v6632_v47 = vld [vmem:[#allocation8 + $0x810] ss:$12 sps:$4 sm:$0xff]   ;;  %v6637_v59 = vld [vmem:[#allocation8 + $0x64c] ss:$12 sps:$4 sm:$0xff]  }
 0x1fd   : > { %v2600_v62 = vmax.f32 %v2425_v54, 0.0  ;;  %v7328_v41 = vpack.c.bf16 %v2599_v33, %v2599_v33  ;;  %v6640_v48 = vld [vmem:[#allocation8 + $0x7fc] ss:$12 sps:$4 sm:$0xff]   ;;  %v6631_v54 = vld [vmem:[#allocation8 + $0x664] ss:$12 sps:$4 sm:$0xff]  }
 0x1fe   : > { %4657 = vmatpush2.bf16.msra.mxu0 %v6581_v55  ;;  %v6638_v55 = vld [vmem:[#allocation8 + $0x7f8] ss:$12 sps:$4 sm:$0xff]   ;;  %v6629_v58 = vld [vmem:[#allocation8 + $0x660] ss:$12 sps:$4 sm:$0xff]   ;;  %v6665_v30 = vld [vmem:[#allocation8 + $0x750] ss:$12 sps:$4 sm:$0xff]  }
 0x1ff   : > { %v7319_v2 = vpack.c.bf16 %v2600_v62, %v2600_v62  ;;  %4698 = vmatpush2.bf16.msra.mxu1 %v6584_v56  ;;  %4658 = vmatprep.subr.bf16.mxu0 %v6589_v60  ;;  %v6646_v56 = vld [vmem:[#allocation8 + $0x7e4] ss:$12 sps:$4 sm:$0xff]   ;;  %v6644_v60 = vld [vmem:[#allocation8 + $0x7e0] ss:$12 sps:$4 sm:$0xff]   ;;  %v6635_v62 = vld [vmem:[#allocation8 + $0x648] ss:$12 sps:$4 sm:$0xff]  }
 0x200   : > { %4699 = vmatprep.subr.bf16.mxu1 %v6592_v63  ;;  %v6650_v63 = vld [vmem:[#allocation8 + $0x7c8] ss:$12 sps:$4 sm:$0xff]  }
 0x201   : > { %4709 = vmatprep.mubr.bf16.mxu1 %v7319_v2 }
 0x202   : > { %4659 = vmatpush2.bf16.msra.mxu0 %v6587_v23  ;;  %v6643_v23 = vld [vmem:[#allocation8 + $0x634] ss:$12 sps:$4 sm:$0xff]  }
 0x203   : > { %4700 = vmatpush2.bf16.msra.mxu1 %v6590_v1  ;;  %4660 = vmatprep.subr.bf16.mxu0 %v6595_v4  ;;  %v6658_v1 = vld [vmem:[#allocation8 + $0x7b4] ss:$12 sps:$4 sm:$0xff]   ;;  %v6641_v4 = vld [vmem:[#allocation8 + $0x630] ss:$12 sps:$4 sm:$0xff]  }
 0x204   : > { %4701 = vmatprep.subr.bf16.mxu1 %v6598_v52  ;;  %v6656_v52 = vld [vmem:[#allocation8 + $0x7b0] ss:$12 sps:$4 sm:$0xff]  }
 0x206   : > { %4661 = vmatpush2.bf16.msra.mxu0 %v6593_v8  ;;  %v6664_v8 = vld [vmem:[#allocation8 + $0x79c] ss:$12 sps:$4 sm:$0xff]  }
 0x207   : > { %4702 = vmatpush2.bf16.msra.mxu1 %v6596_v5  ;;  %4662 = vmatprep.subr.bf16.mxu0 %v6601_v12  ;;  %v6655_v5 = vld [vmem:[#allocation8 + $0x604] ss:$12 sps:$4 sm:$0xff]  }
 0x208   : > { %4703 = vmatprep.subr.bf16.mxu1 %v6604_v14  ;;  %v6662_v12 = vld [vmem:[#allocation8 + $0x798] ss:$12 sps:$4 sm:$0xff]   ;;  %v6653_v14 = vld [vmem:[#allocation8 + $0x600] ss:$12 sps:$4 sm:$0xff]  }
 0x20a   : > { %4663 = vmatpush2.bf16.msra.mxu0 %v6599_v15  ;;  %v6661_v15 = vld [vmem:[#allocation8 + $0x76c] ss:$12 sps:$4 sm:$0xff]  }
 0x20b   : > { %4704 = vmatpush2.bf16.msra.mxu1 %v6602_v21  ;;  %4664 = vmatprep.subr.bf16.mxu0 %v6607_v22  ;;  %v6676_v21 = vld [vmem:[#allocation8 + $0x8ec] ss:$12 sps:$4 sm:$0xff]   ;;  %v6659_v22 = vld [vmem:[#allocation8 + $0x768] ss:$12 sps:$4 sm:$0xff]  }
 0x20c   : > { %4705 = vmatprep.subr.bf16.mxu1 %v6610_v25  ;;  %v6667_v25 = vld [vmem:[#allocation8 + $0x754] ss:$12 sps:$4 sm:$0xff]  }
 0x20e   : > { %4665 = vmatpush2.bf16.msra.mxu0 %v6605_v26  ;;  %v6674_v26 = vld [vmem:[#allocation8 + $0x8e8] ss:$12 sps:$4 sm:$0xff]  }
 0x20f   : > { %4706 = vmatpush2.bf16.msra.mxu1 %v6608_v28  ;;  %4666 = vmatprep.subr.bf16.mxu0 %v6613_v29  ;;  %v6682_v28 = vld [vmem:[#allocation8 + $0x8d4] ss:$12 sps:$4 sm:$0xff]  }
 0x210   : > { %4707 = vmatprep.subr.bf16.mxu1 %v6616_v31 }
 0x212   : > { %4667 = vmatpush2.bf16.msra.mxu0 %v6611_v39  ;;  %v6673_v39 = vld [vmem:[#allocation8 + $0x73c] ss:$12 sps:$4 sm:$0xff]  }
 0x213   : > { %4708 = vmatpush2.bf16.msra.mxu1 %v6614_v19  ;;  %4718 = vmatprep.subr.bf16.mxu0 %v6619_v32  ;;  %v6688_v32 = vld [vmem:[#allocation8 + $0x8bc] ss:$12 sps:$4 sm:$0xff]  }
 0x214   : > { %4759 = vmatprep.subr.bf16.mxu1 %v6628_v34 }
 0x215   : > { %4669 = vmatmul.mubr.bf16.vlgmr.msra.gmra.mxu0 %v7326_v37 }
 0x216   : > { %v7330_v43 = vpop.f32.mrf.mxu1  ;;  %4710 = vmatmul.mubr.bf16.vlgmr.msra.gmra.mxu1 %v7328_v41  ;;  %4719 = vmatpush1.bf16.msra.mxu0 %v6617_v3  ;;  %v6671_v3 = vld [vmem:[#allocation8 + $0x738] ss:$12 sps:$4 sm:$0xff]  }
 0x217   : > { %4720 = vmatprep.subr.bf16.mxu0 %v6622_v38  ;;  %4760 = vmatpush1.bf16.msra.mxu1 %v6626_v40  ;;  %v6679_v40 = vld [vmem:[#allocation8 + $0x724] ss:$12 sps:$4 sm:$0xff]  }
 0x218   : > { %v7334_v16 = vpop.f32.mrf.mxu1  ;;  %4761 = vmatprep.subr.bf16.mxu1 %v6634_v42  ;;  %v6686_v42 = vld [vmem:[#allocation8 + $0x8b8] ss:$12 sps:$4 sm:$0xff]  }
 0x21a   : > { %v2508_v49 = vpop.f32.mrf.mxu1  ;;  %4721 = vmatpush1.bf16.msra.mxu0 %v6620_v44 }
 0x21b   : > { %4722 = vmatprep.subr.bf16.mxu0 %v6625_v45  ;;  %4762 = vmatpush1.bf16.msra.mxu1 %v6632_v47  ;;  %v6694_v45 = vld [vmem:[#allocation8 + $0x8a4] ss:$12 sps:$4 sm:$0xff]   ;;  %v6685_v49 = vld [vmem:[#allocation8 + $0x70c] ss:$12 sps:$4 sm:$0xff]  }
 0x21c   : > { %v2509_v53 = vpop.f32.mrf.mxu1  ;;  %4763 = vmatprep.subr.bf16.mxu1 %v6640_v48  ;;  %v6677_v48 = vld [vmem:[#allocation8 + $0x720] ss:$12 sps:$4 sm:$0xff]  }
 0x21d   : > { %v6683_v53 = vld [vmem:[#allocation8 + $0x708] ss:$12 sps:$4 sm:$0xff]  }
 0x21e   : > { %4723 = vmatpush1.bf16.msra.mxu0 %v6623_v51  ;;  %v6692_v51 = vld [vmem:[#allocation8 + $0x8a0] ss:$12 sps:$4 sm:$0xff]  }
 0x21f   : > { %4724 = vmatprep.subr.bf16.mxu0 %v6631_v54  ;;  %4764 = vmatpush1.bf16.msra.mxu1 %v6638_v55  ;;  %v625_v54 = vrot.slane %v7336_v35, %v7258_v24  ;;  %v6691_v55 = vld [vmem:[#allocation8 + $0x6f4] ss:$12 sps:$4 sm:$0xff]  }
 0x220   : > { %4765 = vmatprep.subr.bf16.mxu1 %v6646_v56  ;;  %v6698_v56 = vld [vmem:[#allocation8 + $0x888] ss:$12 sps:$4 sm:$0xff]  }
 0x222   : > { %4725 = vmatpush1.bf16.msra.mxu0 %v6629_v58  ;;  %v6706_v58 = vld [vmem:[#allocation8 + $0x874] ss:$12 sps:$4 sm:$0xff]  }
 0x223   : > { %4726 = vmatprep.subr.bf16.mxu0 %v6637_v59  ;;  %4766 = vmatpush1.bf16.msra.mxu1 %v6644_v60  ;;  %v6689_v59 = vld [vmem:[#allocation8 + $0x6f0] ss:$12 sps:$4 sm:$0xff]  }
 0x224   : > { %4767 = vmatprep.subr.bf16.mxu1 %v6652_v61  ;;  %v6697_v61 = vld [vmem:[#allocation8 + $0x6dc] ss:$12 sps:$4 sm:$0xff]  }
 0x226   : > { %4727 = vmatpush1.bf16.msra.mxu0 %v6635_v62  ;;  %v6704_v62 = vld [vmem:[#allocation8 + $0x870] ss:$12 sps:$4 sm:$0xff]  }
 0x227   : > { %4728 = vmatprep.subr.bf16.mxu0 %v6643_v23  ;;  %4768 = vmatpush1.bf16.msra.mxu1 %v6650_v63  ;;  %v6711_v23 = vld [vmem:[#allocation8 + $0x85c] ss:$12 sps:$4 sm:$0xff]   ;;  %v6695_v63 = vld [vmem:[#allocation8 + $0x6d8] ss:$12 sps:$4 sm:$0xff]  }
 0x228   : > { %4769 = vmatprep.subr.bf16.mxu1 %v6658_v1 }
 0x22a   : > { %4729 = vmatpush1.bf16.msra.mxu0 %v6641_v4  ;;  %v6703_v4 = vld [vmem:[#allocation8 + $0x6c4] ss:$12 sps:$4 sm:$0xff]  }
 0x22b   : > { %4730 = vmatprep.subr.bf16.mxu0 %v6649_v6  ;;  %4770 = vmatpush1.bf16.msra.mxu1 %v6656_v52  ;;  %v6709_v6 = vld [vmem:[#allocation8 + $0x858] ss:$12 sps:$4 sm:$0xff]  }
 0x22c   : > { %4771 = vmatprep.subr.bf16.mxu1 %v6664_v8  ;;  %v6716_v52 = vld [vmem:[#allocation8 + $0x844] ss:$12 sps:$4 sm:$0xff]   ;;  %v6701_v8 = vld [vmem:[#allocation8 + $0x6c0] ss:$12 sps:$4 sm:$0xff]  }
 0x22e   : > { %4731 = vmatpush1.bf16.msra.mxu0 %v6647_v11 }
 0x22f   : > { %4732 = vmatprep.subr.bf16.mxu0 %v6655_v5  ;;  %4772 = vmatpush1.bf16.msra.mxu1 %v6662_v12  ;;  %v6707_v5 = vld [vmem:[#allocation8 + $0x170] ss:$12 sps:$4 sm:$0xff]   ;;  %v6714_v12 = vld [vmem:[#allocation8 + $0x840] ss:$12 sps:$4 sm:$0xff]  }
 0x230   : > { %4773 = vmatprep.subr.bf16.mxu1 %v6670_v57  ;;  %v6719_v57 = vld [vmem:[#allocation8 + $0x2f0] ss:$12 sps:$4 sm:$0xff]  }
 0x232   : > { %4733 = vmatpush1.bf16.msra.mxu0 %v6653_v14  ;;  %v633_v14 = vrot.slane %v7336_v35, %v7290_v46 }
 0x233   : > { %4734 = vmatprep.subr.bf16.mxu0 %v6661_v15  ;;  %4774 = vmatpush1.bf16.msra.mxu1 %v6668_v20  ;;  %v6712_v20 = vld [vmem:[#allocation8 + $0x158] ss:$12 sps:$4 sm:$0xff]  }
 0x234   : > { %4775 = vmatprep.subr.bf16.mxu1 %v6676_v21  ;;  %v637_v21 = vrot.slane %v7336_v35, %v604_v10  ;;  %v6718_v10 = vld [vmem:[#allocation8 + $0x80] ss:$12 sps:$4 sm:$0xff]  }
 0x235   : > { %v2463_v29 = vpop.f32.mrf.mxu0 }
 0x236   : > { %4735 = vmatpush2.bf16.msra.mxu0 %v6659_v22  ;;  %v2464_v60 = vadd.f32 %v2463_v29, %v625_v54  ;;  %v6730_v54 = vld [vmem:[#allocation8 + $0x38] ss:$12 sps:$4 sm:$0xff]  }
 0x237   : > { %v2465_v31 = vpop.f32.mrf.mxu0  ;;  %4736 = vmatprep.subr.bf16.mxu0 %v6667_v25  ;;  %4776 = vmatpush2.bf16.msra.mxu1 %v6674_v26 }
 0x238   : > { %v2466_v19 = vadd.f32 %v2465_v31, %v629_v27  ;;  %4777 = vmatprep.subr.bf16.mxu1 %v6682_v28  ;;  %v2505_v1 = vadd.f32 %v7330_v43, %v2464_v60  ;;  %v6708_v43 = vld [vmem:[#allocation8 + $0xb0] ss:$12 sps:$4 sm:$0xff]   ;;  %v6713_v27 = vld [vmem:[#allocation8 + $0x98] ss:$12 sps:$4 sm:$0xff]  }
 0x239   : > { %v2467_v33 = vpop.f32.mrf.mxu0  ;;  %v6735_v60 = vld [vmem:[#allocation8 + $0x290] ss:$12 sps:$4 sm:$0xff]  }
 0x23a   : > { %v2507_v34 = vadd.f32 %v7334_v16, %v2466_v19  ;;  %4737 = vmatpush2.bf16.msra.mxu0 %v6665_v30  ;;  %v6700_v16 = vld [vmem:[#allocation8 + $0x88c] ss:$12 sps:$4 sm:$0xff]   ;;  %v2601_v11 = vmax.f32 %v2505_v1, 0.0 }
 0x23b   : > { %v2468_v38 = vpop.f32.mrf.mxu0  ;;  %4738 = vmatprep.subr.bf16.mxu0 %v6673_v39  ;;  %4778 = vmatpush2.bf16.msra.mxu1 %v6680_v7  ;;  %v6717_v30 = vld [vmem:[#allocation8 + $0x140] ss:$12 sps:$4 sm:$0xff]   ;;  %v6740_v1 = vld [vmem:[#allocation8 + $0x1b8] ss:$12 sps:$4 sm:$0xff]  }
 0x23c   : > { %v2602_v44 = vmax.f32 %v2507_v34, 0.0  ;;  %4779 = vmatprep.subr.bf16.mxu1 %v6688_v32  ;;  %v7349_v15 = vpack.c.bf16 %v2601_v11, %v2601_v11  ;;  %v6720_v34 = vld [vmem:[#allocation8 + $0x128] ss:$12 sps:$4 sm:$0xff]   ;;  %v6746_v11 = vld [vmem:[#allocation8 + $0x398] ss:$12 sps:$4 sm:$0xff]  }
 0x23e   : > { %v7341_v47 = vpack.c.bf16 %v2602_v44, %v2602_v44  ;;  %4739 = vmatpush2.bf16.msra.mxu0 %v6671_v3  ;;  %v6723_v44 = vld [vmem:[#allocation8 + $0x2d8] ss:$12 sps:$4 sm:$0xff]  }
 0x23f   : > { %4740 = vmatprep.subr.bf16.mxu0 %v6679_v40  ;;  %4780 = vmatpush2.bf16.msra.mxu1 %v6686_v42  ;;  %v6722_v40 = vld [vmem:[#allocation8 + $0x68] ss:$12 sps:$4 sm:$0xff]  }
 0x240   : > { %4750 = vmatprep.mubr.bf16.mxu0 %v7341_v47  ;;  %4781 = vmatprep.subr.bf16.mxu1 %v6694_v45  ;;  %v6724_v45 = vld [vmem:[#allocation8 + $0x110] ss:$12 sps:$4 sm:$0xff]  }
 0x242   : > { %4741 = vmatpush2.bf16.msra.mxu0 %v6677_v48  ;;  %v6725_v48 = vld [vmem:[#allocation8 + $0x218] ss:$12 sps:$4 sm:$0xff]  }
 0x243   : > { %4742 = vmatprep.subr.bf16.mxu0 %v6685_v49  ;;  %4782 = vmatpush2.bf16.msra.mxu1 %v6692_v51  ;;  %v6726_v49 = vld [vmem:[#allocation8 + $0x50] ss:$12 sps:$4 sm:$0xff]   ;;  %v6727_v51 = vld [vmem:[#allocation8 + $0x2c0] ss:$12 sps:$4 sm:$0xff]  }
 0x244   : > { %4783 = vmatprep.subr.bf16.mxu1 %v6700_v16  ;;  %v6728_v16 = vld [vmem:[#allocation8 + $0xf8] ss:$12 sps:$4 sm:$0xff]  }
 0x246   : > { %4743 = vmatpush2.bf16.msra.mxu0 %v6683_v53  ;;  %v6729_v53 = vld [vmem:[#allocation8 + $0x200] ss:$12 sps:$4 sm:$0xff]  }
 0x247   : > { %4744 = vmatprep.subr.bf16.mxu0 %v6691_v55  ;;  %4784 = vmatpush2.bf16.msra.mxu1 %v6698_v56  ;;  %v6731_v55 = vld [vmem:[#allocation8 + $0x2a8] ss:$12 sps:$4 sm:$0xff]   ;;  %v6732_v56 = vld [vmem:[#allocation8 + $0xe0] ss:$12 sps:$4 sm:$0xff]  }
 0x248   : > { %4785 = vmatprep.subr.bf16.mxu1 %v6706_v58  ;;  %v6733_v58 = vld [vmem:[#allocation8 + $0x1e8] ss:$12 sps:$4 sm:$0xff]  }
 0x24a   : > { %4745 = vmatpush2.bf16.msra.mxu0 %v6689_v59  ;;  %v6734_v59 = vld [vmem:[#allocation8 + $0x20] ss:$12 sps:$4 sm:$0xff]  }
 0x24b   : > { %4746 = vmatprep.subr.bf16.mxu0 %v6697_v61  ;;  %4786 = vmatpush2.bf16.msra.mxu1 %v6704_v62  ;;  %v6737_v61 = vld [vmem:[#allocation8 + $0x1d0] ss:$12 sps:$4 sm:$0xff]   ;;  %v6738_v62 = vld [vmem:[#allocation8 + $0x8] ss:$12 sps:$4 sm:$0xff]  }
 0x24c   : > { %4787 = vmatprep.subr.bf16.mxu1 %v6711_v23  ;;  %v6739_v23 = vld [vmem:[#allocation8 + $0x278] ss:$12 sps:$4 sm:$0xff]  }
 0x24e   : > { %4747 = vmatpush2.bf16.msra.mxu0 %v6695_v63  ;;  %v6741_v63 = vld [vmem:[#allocation8 + $0x470] ss:$12 sps:$4 sm:$0xff]  }
 0x24f   : > { %4748 = vmatprep.subr.bf16.mxu0 %v6703_v4  ;;  %4788 = vmatpush2.bf16.msra.mxu1 %v6709_v6  ;;  %v6742_v4 = vld [vmem:[#allocation8 + $0x3b0] ss:$12 sps:$4 sm:$0xff]   ;;  %v6743_v6 = vld [vmem:[#allocation8 + $0x260] ss:$12 sps:$4 sm:$0xff]  }
 0x250   : > { %4789 = vmatprep.subr.bf16.mxu1 %v6716_v52  ;;  %v6745_v52 = vld [vmem:[#allocation8 + $0x458] ss:$12 sps:$4 sm:$0xff]  }
 0x252   : > { %4749 = vmatpush2.bf16.msra.mxu0 %v6701_v8  ;;  %v6744_v8 = vld [vmem:[#allocation8 + $0x1a0] ss:$12 sps:$4 sm:$0xff]  }
 0x253   : > { %5761 = vmatprep.subr.bf16.mxu0 %v6707_v5  ;;  %4790 = vmatpush2.bf16.msra.mxu1 %v6714_v12  ;;  %v6747_v5 = vld [vmem:[#allocation8 + $0x248] ss:$12 sps:$4 sm:$0xff]   ;;  %v6749_v12 = vld [vmem:[#allocation8 + $0x440] ss:$12 sps:$4 sm:$0xff]  }
 0x254   : > { %5783 = vmatprep.subr.bf16.mxu1 %v6719_v57  ;;  %v6748_v57 = vld [vmem:[#allocation8 + $0x188] ss:$12 sps:$4 sm:$0xff]  }
 0x255   : > { %v2586_v25 = vpop.f32.mrf.mxu0  ;;  %4751 = vmatmul.mubr.bf16.vlgmr.msra.gmra.mxu0 %v7349_v15 }
 0x256   : > { %v2545_v22 = vpop.f32.mrf.mxu1  ;;  %5762 = vmatpush3.bf16.msra.mxu0 %v6708_v43  ;;  %4832 = vmatprep.mubr.bf16.mxu0 %v7274_v13  ;;  %v6721_v13 = vld [vmem:[#allocation8 + $0x230] ss:$12 sps:$4 sm:$0xff]  }
 0x257   : > { %v2546_v26 = vadd.f32 %v2545_v22, %v633_v14  ;;  %v2588_v29 = vpop.f32.mrf.mxu0  ;;  %5763 = vmatprep.subr.bf16.mxu0 %v6712_v20  ;;  %v6750_v14 = vld [vmem:[#allocation8 + $0x380] ss:$12 sps:$4 sm:$0xff]   ;;  %v6751_v43 = vld [vmem:[#allocation8 + $0x5f0] ss:$12 sps:$4 sm:$0xff]   ;;  %v6752_v20 = vld [vmem:[#allocation8 + $0x428] ss:$12 sps:$4 sm:$0xff]  }
 0x258   : > { %v2547_v28 = vpop.f32.mrf.mxu1  ;;  %v6755_v22 = vld [vmem:[#allocation8 + $0x5d8] ss:$12 sps:$4 sm:$0xff]  }
 0x259   : > { %v2587_v31 = vadd.f32 %v2586_v25, %v2546_v26  ;;  %v2548_v39 = vadd.f32 %v2547_v28, %v637_v21  ;;  %v2590_v18 = vpop.f32.mrf.mxu0  ;;  %v6754_v21 = vld [vmem:[#allocation8 + $0x368] ss:$12 sps:$4 sm:$0xff]   ;;  %v6757_v25 = vld [vmem:[#allocation8 + $0x518] ss:$12 sps:$4 sm:$0xff]   ;;  %v6758_v26 = vld [vmem:[#allocation8 + $0x350] ss:$12 sps:$4 sm:$0xff]  }
 0x25a   : > { %v2549_v7 = vpop.f32.mrf.mxu1  ;;  %5764 = vmatpush3.bf16.msra.mxu0 %v6713_v27  ;;  %v6759_v27 = vld [vmem:[#allocation8 + $0x5c0] ss:$12 sps:$4 sm:$0xff]   ;;  %v6760_v28 = vld [vmem:[#allocation8 + $0x3f8] ss:$12 sps:$4 sm:$0xff]   ;;  %v6768_v18 = vld [vmem:[#allocation8 + $0x3c8] ss:$12 sps:$4 sm:$0xff]  }
 0x25b   : > { %v2589_v19 = vadd.f32 %v2588_v29, %v2548_v39  ;;  %v2603_v35 = vmax.f32 %v2587_v31, 0.0  ;;  %v2591_v33 = vpop.f32.mrf.mxu0  ;;  %5765 = vmatprep.subr.bf16.mxu0 %v6717_v30  ;;  %v6761_v29 = vld [vmem:[#allocation8 + $0x500] ss:$12 sps:$4 sm:$0xff]   ;;  %v6762_v30 = vld [vmem:[#allocation8 + $0x338] ss:$12 sps:$4 sm:$0xff]  }
 0x25c   : > { %v2550_v32 = vpop.f32.mrf.mxu1  ;;  %v6763_v31 = vld [vmem:[#allocation8 + $0x5a8] ss:$12 sps:$4 sm:$0xff]   ;;  %v6764_v39 = vld [vmem:[#allocation8 + $0x3e0] ss:$12 sps:$4 sm:$0xff]   ;;  %v6767_v7 = vld [vmem:[#allocation8 + $0x590] ss:$12 sps:$4 sm:$0xff]  }
 0x25d   : > { %v2604_v3 = vmax.f32 %v2589_v19, 0.0  ;;  %v7358_v42 = vpack.c.bf16 %v2603_v35, %v2603_v35  ;;  %v6769_v19 = vld [vmem:[#allocation8 + $0x4d0] ss:$12 sps:$4 sm:$0xff]   ;;  %v6771_v35 = vld [vmem:[#allocation8 + $0x578] ss:$12 sps:$4 sm:$0xff]  }
 0x25e   : > { %5766 = vmatpush3.bf16.msra.mxu0 %v6718_v10  ;;  %v6770_v10 = vld [vmem:[#allocation8 + $0x308] ss:$12 sps:$4 sm:$0xff]   ;;  %v7367_v32 = vld [vmem:[#allocation10] sm:$0x7]  ;;  %v6773_v33 = vld [vmem:[#allocation8 + $0x770] ss:$12 sps:$4 sm:$0xff]  }
 0x25f   : > { %v7356_v38 = vpack.c.bf16 %v2604_v3, %v2604_v3  ;;  %5767 = vmatprep.subr.bf16.mxu0 %v6720_v34  ;;  %v3006_v34 = vrot.slane %v7367_v32, %v7258_v24  ;;  %v6772_v3 = vld [vmem:[#allocation8 + $0x4b8] ss:$12 sps:$4 sm:$0xff]  }
 0x261   : > { %4791 = vmatprep.mubr.bf16.mxu1 %v7356_v38 }
 0x262   : > { %4792 = vmatmul.mubr.bf16.vlgmr.msra.gmra.mxu1 %v7358_v42  ;;  %5768 = vmatpush3.bf16.msra.mxu0 %v6722_v40  ;;  %v3010_v40 = vrot.slane %v7367_v32, %v7268_v50  ;;  %v6781_v50 = vld [vmem:[#allocation8 + $0x740] ss:$12 sps:$4 sm:$0xff]  }
 0x263   : > { %5784 = vmatpush3.bf16.msra.mxu1 %v6721_v13  ;;  %4872 = vmatprep.mubr.bf16.mxu1 %v7286_v36  ;;  %v6736_v36 = vld [vmem:[#allocation8 + $0xc8] ss:$12 sps:$4 sm:$0xff]   ;;  %v6774_v13 = vld [vmem:[#allocation8 + $0x6b0] ss:$12 sps:$4 sm:$0xff]  }
 0x264   : > { %5785 = vmatprep.subr.bf16.mxu1 %v6723_v44  ;;  %5769 = vmatprep.subr.bf16.mxu0 %v6724_v45  ;;  %v6775_v44 = vld [vmem:[#allocation8 + $0x560] ss:$12 sps:$4 sm:$0xff]   ;;  %v6777_v45 = vld [vmem:[#allocation8 + $0x758] ss:$12 sps:$4 sm:$0xff]  }
 0x266   : > { %5770 = vmatpush3.bf16.msra.mxu0 %v6726_v49 }
 0x267   : > { %5786 = vmatpush3.bf16.msra.mxu1 %v6725_v48  ;;  %5771 = vmatprep.subr.bf16.mxu0 %v6728_v16  ;;  %v6776_v16 = vld [vmem:[#allocation8 + $0x4a0] ss:$12 sps:$4 sm:$0xff]  }
 0x268   : > { %5787 = vmatprep.subr.bf16.mxu1 %v6727_v51 }
 0x26a   : > { %5772 = vmatpush3.bf16.msra.mxu0 %v6730_v54  ;;  %v6779_v54 = vld [vmem:[#allocation8 + $0x548] ss:$12 sps:$4 sm:$0xff]  }
 0x26b   : > { %5788 = vmatpush3.bf16.msra.mxu1 %v6729_v53  ;;  %5773 = vmatprep.subr.bf16.mxu0 %v6732_v56  ;;  %v6778_v53 = vld [vmem:[#allocation8 + $0x698] ss:$12 sps:$4 sm:$0xff]  }
 0x26c   : > { %5789 = vmatprep.subr.bf16.mxu1 %v6731_v55 }
 0x26e   : > { %5774 = vmatpush3.bf16.msra.mxu0 %v6734_v59 }
 0x26f   : > { %5790 = vmatpush3.bf16.msra.mxu1 %v6733_v58  ;;  %5775 = vmatprep.subr.bf16.mxu0 %v6736_v36 }
 0x270   : > { %5791 = vmatprep.subr.bf16.mxu1 %v6735_v60 }
 0x272   : > { %5776 = vmatpush3.bf16.msra.mxu0 %v6738_v62  ;;  %v6783_v62 = vld [vmem:[#allocation8 + $0x8f0] ss:$12 sps:$4 sm:$0xff]  }
 0x273   : > { %5792 = vmatpush3.bf16.msra.mxu1 %v6737_v61  ;;  %5805 = vmatprep.subr.bf16.mxu0 %v6741_v63  ;;  %v6784_v63 = vld [vmem:[#allocation8 + $0x728] ss:$12 sps:$4 sm:$0xff]  }
 0x274   : > { %5793 = vmatprep.subr.bf16.mxu1 %v6739_v23 }
 0x275   : > { %4833 = vmatmul.mubr.bf16.vlgmr.msra.gmra.mxu0 %v7302_v17  ;;  %v6753_v17 = vld [vmem:[#allocation8 + $0x530] ss:$12 sps:$4 sm:$0xff]  }
 0x276   : > { %5806 = vmatpush3.bf16.msra.mxu0 %v6742_v4  ;;  %4912 = vmatprep.mubr.bf16.mxu0 %v7312_v9  ;;  %v6756_v9 = vld [vmem:[#allocation8 + $0x410] ss:$12 sps:$4 sm:$0xff]   ;;  %v6786_v4 = vld [vmem:[#allocation8 + $0x668] ss:$12 sps:$4 sm:$0xff]  }
 0x277   : > { %5794 = vmatpush3.bf16.msra.mxu1 %v6740_v1  ;;  %5807 = vmatprep.subr.bf16.mxu0 %v6745_v52  ;;  %v6785_v1 = vld [vmem:[#allocation8 + $0x830] ss:$12 sps:$4 sm:$0xff]  }
 0x278   : > { %5795 = vmatprep.subr.bf16.mxu1 %v6743_v6  ;;  %v6787_v6 = vld [vmem:[#allocation8 + $0x8d8] ss:$12 sps:$4 sm:$0xff]   ;;  %v6788_v52 = vld [vmem:[#allocation8 + $0x710] ss:$12 sps:$4 sm:$0xff]  }
 0x27a   : > { %5808 = vmatpush3.bf16.msra.mxu0 %v6746_v11  ;;  %v6790_v11 = vld [vmem:[#allocation8 + $0x650] ss:$12 sps:$4 sm:$0xff]  }
 0x27b   : > { %5796 = vmatpush3.bf16.msra.mxu1 %v6744_v8  ;;  %5809 = vmatprep.subr.bf16.mxu0 %v6749_v12  ;;  %v6789_v8 = vld [vmem:[#allocation8 + $0x818] ss:$12 sps:$4 sm:$0xff]  }
 0x27c   : > { %5797 = vmatprep.subr.bf16.mxu1 %v6747_v5  ;;  %v6791_v5 = vld [vmem:[#allocation8 + $0x8c0] ss:$12 sps:$4 sm:$0xff]   ;;  %v6792_v12 = vld [vmem:[#allocation8 + $0x6f8] ss:$12 sps:$4 sm:$0xff]  }
 0x27e   : > { %5810 = vmatpush3.bf16.msra.mxu0 %v6750_v14  ;;  %v6794_v14 = vld [vmem:[#allocation8 + $0x638] ss:$12 sps:$4 sm:$0xff]  }
 0x27f   : > { %5798 = vmatpush3.bf16.msra.mxu1 %v6748_v57  ;;  %5811 = vmatprep.subr.bf16.mxu0 %v6752_v20  ;;  %v6793_v57 = vld [vmem:[#allocation8 + $0x800] ss:$12 sps:$4 sm:$0xff]  }
 0x280   : > { %5827 = vmatprep.subr.bf16.mxu1 %v6751_v43  ;;  %v6795_v43 = vld [vmem:[#allocation8 + $0x8a8] ss:$12 sps:$4 sm:$0xff]   ;;  %v6796_v20 = vld [vmem:[#allocation8 + $0x6e0] ss:$12 sps:$4 sm:$0xff]  }
 0x282   : > { %4873 = vmatmul.mubr.bf16.vlgmr.msra.gmra.mxu1 %v7304_v0  ;;  %5812 = vmatpush3.bf16.msra.mxu0 %v6754_v21  ;;  %v6765_v0 = vld [vmem:[#allocation8 + $0x4e8] ss:$12 sps:$4 sm:$0xff]  }
 0x283   : > { %5828 = vmatpush3.bf16.msra.mxu1 %v6753_v17  ;;  %4952 = vmatprep.mubr.bf16.mxu1 %v7319_v2  ;;  %v6766_v2 = vld [vmem:[#allocation8 + $0x320] ss:$12 sps:$4 sm:$0xff]   ;;  %v6799_v17 = vld [vmem:[#allocation8 + $0x890] ss:$12 sps:$4 sm:$0xff]   ;;  %v6800_v21 = vld [vmem:[#allocation8 + $0x6c8] ss:$12 sps:$4 sm:$0xff]  }
 0x284   : > { %5829 = vmatprep.subr.bf16.mxu1 %v6755_v22  ;;  %5813 = vmatprep.subr.bf16.mxu0 %v6756_v9  ;;  %v6801_v22 = vld [vmem:[#allocation8 + $0x7d0] ss:$12 sps:$4 sm:$0xff]   ;;  %v6802_v9 = vld [vmem:[#allocation8 + $0x608] ss:$12 sps:$4 sm:$0xff]  }
 0x286   : > { %5814 = vmatpush3.bf16.msra.mxu0 %v6758_v26  ;;  %v6804_v26 = vld [vmem:[#allocation8 + $0x7b8] ss:$12 sps:$4 sm:$0xff]  }
 0x287   : > { %5830 = vmatpush3.bf16.msra.mxu1 %v6757_v25  ;;  %5815 = vmatprep.subr.bf16.mxu0 %v6760_v28  ;;  %v6803_v25 = vld [vmem:[#allocation8 + $0x878] ss:$12 sps:$4 sm:$0xff]   ;;  %v6806_v28 = vld [vmem:[#allocation8 + $0x7a0] ss:$12 sps:$4 sm:$0xff]  }
 0x288   : > { %5831 = vmatprep.subr.bf16.mxu1 %v6759_v27  ;;  %v6805_v27 = vld [vmem:[#allocation8 + $0x860] ss:$12 sps:$4 sm:$0xff]  }
 0x28a   : > { %5816 = vmatpush3.bf16.msra.mxu0 %v6762_v30  ;;  %v6808_v30 = vld [vmem:[#allocation8 + $0x788] ss:$12 sps:$4 sm:$0xff]  }
 0x28b   : > { %5832 = vmatpush3.bf16.msra.mxu1 %v6761_v29  ;;  %5817 = vmatprep.subr.bf16.mxu0 %v6764_v39  ;;  %v6807_v29 = vld [vmem:[#allocation8 + $0x848] ss:$12 sps:$4 sm:$0xff]  }
 0x28c   : > { %5833 = vmatprep.subr.bf16.mxu1 %v6763_v31 }
 0x28e   : > { %5818 = vmatpush3.bf16.msra.mxu0 %v6766_v2 }
 0x28f   : > { %5834 = vmatpush3.bf16.msra.mxu1 %v6765_v0  ;;  %5819 = vmatprep.subr.bf16.mxu0 %v6768_v18 }
 0x290   : > { %5835 = vmatprep.subr.bf16.mxu1 %v6767_v7 }
 0x292   : > { %5820 = vmatpush3.bf16.msra.mxu0 %v6770_v10 }
 0x293   : > { %5836 = vmatpush3.bf16.msra.mxu1 %v6769_v19  ;;  %5849 = vmatprep.subr.bf16.mxu0 %v6773_v33 }
 0x294   : > { %5837 = vmatprep.subr.bf16.mxu1 %v6771_v35 }
 0x295   : > { %v4588_v48 = vpop.f32.mrf.mxu0  ;;  %4913 = vmatmul.mubr.bf16.vlgmr.msra.gmra.mxu0 %v7326_v37  ;;  %v6780_v37 = vld [vmem:[#allocation8 + $0x488] ss:$12 sps:$4 sm:$0xff]  }
 0x296   : > { %v4589_v49 = vadd.f32 %v4588_v48, %v3006_v34  ;;  %v4629_v51 = vpop.f32.mrf.mxu1  ;;  %5850 = vmatpush3.bf16.msra.mxu0 %v6774_v13  ;;  %4992 = vmatprep.mubr.bf16.mxu0 %v7341_v47  ;;  %v6782_v47 = vld [vmem:[#allocation8 + $0x680] ss:$12 sps:$4 sm:$0xff]  }
 0x297   : > { %5838 = vmatpush3.bf16.msra.mxu1 %v6772_v3  ;;  %v4590_v24 = vpop.f32.mrf.mxu0  ;;  %5851 = vmatprep.subr.bf16.mxu0 %v6777_v45 }
 0x298   : > { %v7375_v55 = vadd.f32 %v4629_v51, %v4589_v49  ;;  %v4591_v56 = vadd.f32 %v4590_v24, %v3010_v40  ;;  %v4631_v58 = vpop.f32.mrf.mxu1  ;;  %5839 = vmatprep.subr.bf16.mxu1 %v6775_v44 }
 0x299   : > { %v4592_v59 = vpop.f32.mrf.mxu0 }
 0x29a   : > { %v7377_v60 = vadd.f32 %v4631_v58, %v4591_v56  ;;  %v4633_v36 = vpop.f32.mrf.mxu1  ;;  %5852 = vmatpush3.bf16.msra.mxu0 %v6778_v53 }
 0x29b   : > { %5840 = vmatpush3.bf16.msra.mxu1 %v6776_v16  ;;  %v4593_v61 = vpop.f32.mrf.mxu0  ;;  %5853 = vmatprep.subr.bf16.mxu0 %v6781_v50 }
 0x29c   : > { %5841 = vmatprep.subr.bf16.mxu1 %v6779_v54  ;;  %v4634_v23 = vpop.f32.mrf.mxu1 }
 0x29e   : > { %5854 = vmatpush3.bf16.msra.mxu0 %v6782_v47 }
 0x29f   : > { %5842 = vmatpush3.bf16.msra.mxu1 %v6780_v37  ;;  %5855 = vmatprep.subr.bf16.mxu0 %v6784_v63 }
 0x2a0   : > { %5871 = vmatprep.subr.bf16.mxu1 %v6783_v62 }
 0x2a2   : > { %4953 = vmatmul.mubr.bf16.vlgmr.msra.gmra.mxu1 %v7328_v41  ;;  %5856 = vmatpush3.bf16.msra.mxu0 %v6786_v4  ;;  %v6797_v41 = vld [vmem:[#allocation8 + $0x7e8] ss:$12 sps:$4 sm:$0xff]  }
 0x2a3   : > { %5872 = vmatpush3.bf16.msra.mxu1 %v6785_v1  ;;  %5032 = vmatprep.mubr.bf16.mxu1 %v7356_v38  ;;  %v6798_v38 = vld [vmem:[#allocation8 + $0x620] ss:$12 sps:$4 sm:$0xff]  }
 0x2a4   : > { %5873 = vmatprep.subr.bf16.mxu1 %v6787_v6  ;;  %5857 = vmatprep.subr.bf16.mxu0 %v6788_v52 }
 0x2a6   : > { %5858 = vmatpush3.bf16.msra.mxu0 %v6790_v11 }
 0x2a7   : > { %5874 = vmatpush3.bf16.msra.mxu1 %v6789_v8  ;;  %5859 = vmatprep.subr.bf16.mxu0 %v6792_v12  ;;  %v3014_v8 = vrot.slane %v7367_v32, %v7290_v46 }
 0x2a8   : > { %5875 = vmatprep.subr.bf16.mxu1 %v6791_v5 }
 0x2aa   : > { %5860 = vmatpush3.bf16.msra.mxu0 %v6794_v14 }
 0x2ab   : > { %5876 = vmatpush3.bf16.msra.mxu1 %v6793_v57  ;;  %5861 = vmatprep.subr.bf16.mxu0 %v6796_v20 }
 0x2ac   : > { %5877 = vmatprep.subr.bf16.mxu1 %v6795_v43 }
 0x2ae   : > { %5862 = vmatpush3.bf16.msra.mxu0 %v6798_v38 }
 0x2af   : > { %5878 = vmatpush3.bf16.msra.mxu1 %v6797_v41  ;;  %5863 = vmatprep.subr.bf16.mxu0 %v6800_v21 }
 0x2b0   : > { %5879 = vmatprep.subr.bf16.mxu1 %v6799_v17 }
 0x2b2   : > { %5864 = vmatpush3.bf16.msra.mxu0 %v6802_v9 }
 0x2b3   : > { %5880 = vmatpush3.bf16.msra.mxu1 %v6801_v22 }
 0x2b4   : > { %5881 = vmatprep.subr.bf16.mxu1 %v6803_v25 }
 0x2b5   : > { %4993 = vmatmul.mubr.bf16.vlgmr.msra.gmra.mxu0 %v7349_v15 }
 0x2b7   : > { %5882 = vmatpush3.bf16.msra.mxu1 %v6804_v26 }
 0x2b8   : > { %5883 = vmatprep.subr.bf16.mxu1 %v6805_v27 }
 0x2bb   : > { %5884 = vmatpush3.bf16.msra.mxu1 %v6806_v28 }
 0x2bc   : > { %5885 = vmatprep.subr.bf16.mxu1 %v6807_v29 }
 0x2bf   : > { %5886 = vmatpush3.bf16.msra.mxu1 %v6808_v30 }
 0x2c2   : > { %5033 = vmatmul.mubr.bf16.vlgmr.msra.gmra.mxu1 %v7358_v42 }
 0x2d5   : > { %v4670_v31 = vpop.f32.mrf.mxu0 }
 0x2d6   : > { %v4671_v39 = vadd.f32 %v4670_v31, %v7375_v55  ;;  %v4711_v0 = vpop.f32.mrf.mxu1 }
 0x2d7   : > { %v4672_v2 = vpop.f32.mrf.mxu0 }
 0x2d8   : > { %v4712_v7 = vadd.f32 %v4711_v0, %v4671_v39  ;;  %v4673_v18 = vadd.f32 %v4672_v2, %v7377_v60  ;;  %v4713_v15 = vpop.f32.mrf.mxu1 }
 0x2d9   : > { %v4674_v19 = vpop.f32.mrf.mxu0 }
 0x2da   : > { %v4714_v10 = vadd.f32 %v4713_v15, %v4673_v18  ;;  %v4715_v35 = vpop.f32.mrf.mxu1 }
 0x2db   : > { %v4675_v33 = vpop.f32.mrf.mxu0 }
 0x2dc   : > { %v4716_v34 = vpop.f32.mrf.mxu1 }
 0x315   : > { %v4752_v3 = vpop.f32.mrf.mxu0 }
 0x316   : > { %v4753_v42 = vadd.f32 %v4752_v3, %v4712_v7 }
 0x317   : > { %v4754_v13 = vpop.f32.mrf.mxu0 }
 0x318   : > { %v4755_v48 = vadd.f32 %v4754_v13, %v4714_v10 }
 0x319   : > { %v4756_v40 = vpop.f32.mrf.mxu0 }
 0x31b   : > { %v4757_v44 = vpop.f32.mrf.mxu0 }
 0x322   : > { %v4793_v45 = vpop.f32.mrf.mxu1 }
 0x323   : > { %v4794_v49 = vadd.f32 %v4793_v45, %v4753_v42 }
 0x324   : > { %v4795_v51 = vpop.f32.mrf.mxu1 }
 0x325   : > { %5040 = vst [vmem:[%s7386_s11] sm:$0xff] %v4794_v49  ;;  %v4796_v16 = vadd.f32 %v4795_v51, %v4755_v48 }
 0x326   : > { %v4797_v24 = vpop.f32.mrf.mxu1 }
 0x327   : > { %5041 = vst [vmem:[%s7386_s11 + $0x8] sm:$0xff] %v4796_v16 }
 0x328   : > { %v4798_v53 = vpop.f32.mrf.mxu1 }
 0x335   : > { %v5777_v54 = vpop.f32.mrf.mxu0 }
 0x337   : > { %v5778_v55 = vpop.f32.mrf.mxu0 }
 0x338   : > { %v5779_v56 = vadd.f32 %v5778_v55, %v5777_v54 }
 0x339   : > { %v5780_v58 = vpop.f32.mrf.mxu0 }
 0x33a   : > { %v4835_v57 = vadd.f32 %v5779_v56, %v3014_v8 }
 0x33b   : > { %v5781_v50 = vpop.f32.mrf.mxu0 }
 0x342   : > { %v5799_v59 = vpop.f32.mrf.mxu1 }
 0x344   : > { %v5800_v60 = vpop.f32.mrf.mxu1 }
 0x345   : > { %v5801_v5 = vadd.f32 %v5800_v60, %v5799_v59 }
 0x346   : > { %v5802_v36 = vpop.f32.mrf.mxu1 }
 0x347   : > { %v4875_v20 = vadd.f32 %v5801_v5, %v4835_v57 }
 0x348   : > { %v5803_v37 = vpop.f32.mrf.mxu1 }
 0x355   : > { %v5821_v61 = vpop.f32.mrf.mxu0 }
 0x357   : > { %v5822_v47 = vpop.f32.mrf.mxu0 }
 0x358   : > { %v5823_v14 = vadd.f32 %v5822_v47, %v5821_v61 }
 0x359   : > { %v5824_v62 = vpop.f32.mrf.mxu0 }
 0x35a   : > { %v4915_v38 = vadd.f32 %v5823_v14, %v4875_v20 }
 0x35b   : > { %v5825_v23 = vpop.f32.mrf.mxu0 }
 0x362   : > { %v5843_v63 = vpop.f32.mrf.mxu1 }
 0x364   : > { %v5844_v1 = vpop.f32.mrf.mxu1 }
 0x365   : > { %v5845_v41 = vadd.f32 %v5844_v1, %v5843_v63 }
 0x366   : > { %v5846_v4 = vpop.f32.mrf.mxu1 }
 0x367   : > { %v4955_v22 = vadd.f32 %v5845_v41, %v4915_v38 }
 0x368   : > { %v5847_v6 = vpop.f32.mrf.mxu1 }
 0x375   : > { %v5865_v52 = vpop.f32.mrf.mxu0 }
 0x377   : > { %v5866_v11 = vpop.f32.mrf.mxu0 }
 0x378   : > { %v5867_v17 = vadd.f32 %v5866_v11, %v5865_v52 }
 0x379   : > { %v5868_v12 = vpop.f32.mrf.mxu0 }
 0x37a   : > { %v4995_v25 = vadd.f32 %v5867_v17, %v4955_v22 }
 0x37b   : > { %v5869_v43 = vpop.f32.mrf.mxu0 }
 0x382   : > { %v5887_v21 = vpop.f32.mrf.mxu1 }
 0x384   : > { %v5888_v9 = vpop.f32.mrf.mxu1 }
 0x385   : > { %v5889_v46 = vadd.f32 %v5888_v9, %v5887_v21 }
 0x386   : > { %v5890_v32 = vpop.f32.mrf.mxu1 }
 0x387   : > { %v5035_v26 = vadd.f32 %v5889_v46, %v4995_v25 }
 0x388   : > { %v5891_v27 = vpop.f32.mrf.mxu1 }
 0x389   : > { %5042 = vst [vmem:[%s7386_s11 + $0x10] sm:$0xff] %v5035_v26 }
 0x38a   : > { %6956 = shalt.err (!%p6953_p11)
}
 0x38b   : > { %s6957_s27 = scalar_lea.hbm %s7397_s22, 384  ;;  %s6961_s8 = scalar_lea.hbm %s7440_s5, 768 }
 0x38c   : > { %p6958_p12 = scmp.ne.s32.totalorder %s7397_s22, %s6957_s27  ;;  %p6962_p4 = scmp.lt.s32.totalorder %s7397_s22, %s7440_s5 }
 0x38d   : > { %p6963_p13 = scmp.lt.s32.totalorder %s6961_s8, %s6957_s27 }
 0x38e   : > { %p6959_p1 = pnand %p6958_p12, %p7457_p7 }
 0x38f   : > { %p6964_p5 = por %p6963_p13, %p6962_p4 }
 0x390   : > { %p6960_p3 = pneg %p6959_p1 }
 0x392   : > { %p6965_p8 = pnand %p6964_p5, %p6960_p3 }
 0x394   : > { %6968 = shalt.err (!%p6965_p8)
}
 0x395   : > { %5916 = dma.vmem_to_hbm [thread:$0]  (%p7457_p7), %s5059_s26, 384, %s7397_s22, %s5044_s16  }
 0x396 PF: > { %s5070_s11 = sand.u32 1, %s7003_s18   ;;  %p7458_p10 = scmp.ne.s32.totalorder %s7449_s14, 0 }
 0x397   : > { %p7459_p6 = scmp.ge.s32.totalorder %s7015_s21, 2  ;;  %s5071_s17 = scalar_lea.sflag [#allocation4], %s5070_s11 }
 0x399   : > { %p5936_p0 = pnand %p7459_p6, %p7458_p10 }
 0x39b   : > { %p5937_p2 = pneg %p5936_p0 }
 0x39d   : > { %6998 = dma.done.wait (%p5937_p2), %s5071_s17, 384  }
 0x39e   : > { %7000 = vsyncadd (%p5937_p2), %s5071_s17, 4294966912  ;;  %p20_p9 = scmp.ge.s32.totalorder %s7143_s28, 4   ;;  %s7460_s18 = smov %s7007_s19 }
 0x39f   : > { %s7461_s19 = smov %s7011_s20  ;;  %s7462_s20 = smov %s7154_s10 }
 0x3a0   : > { %s7463_s21 = smov %s7143_s28  ;;  %22 = sbr.rel (!%p20_p9) target bundleno = 7 (0x7), region = 101 }
 0x3a5   :  { %5076 = vsyncpa [#allocation3], 1 }
 0x3a6   :  { %5078 = vsyncpa [#allocation3 + $0x1], 1 }
 0x3a7   :  { %5079 = vsyncpa [#allocation6], 1 }
 0x3a8   :  { %5080 = vsyncpa [#allocation9], 1 }
 0x3a9   :  { %5081 = vsyncpa [#allocation4], 1 }
 0x3aa   :  { %5083 = vsyncpa [#allocation4 + $0x1], 1 }

</bundles_post_ra>
